<compile_context>
chip_gen: v7x
topology: tpu7x:2x2x1
jax: 0.10.0
libtpu: 0.0.40
codegen_flags: <defaults>
</compile_context>

<pallas_src>
import functools

import jax
import jax.numpy as jnp
from jax.experimental import pallas as pl
from jax.experimental.pallas import tpu as pltpu


def _ds(start, size, stride):
    return pl.ds(start, size) if stride == 1 else pl.ds(start, size, stride)


def _basic_block_kernel(xp_ref, w1_ref, w2_ref, s1_ref, b1_ref, s2_ref,
                        b2_ref, proj_ref, o_ref, pad_scr, *,
                        stride, sc_stride, ho, wo, c_in, planes):
    f32 = jnp.float32
    hw = ho * wo

    # ---- conv1: 3x3, stride=`stride`; input already carries a 1-pixel halo ----
    acc1 = jnp.zeros((hw, planes), f32)
    for kh in range(3):
        for kw in range(3):
            patch = xp_ref[_ds(kh, ho, stride), _ds(kw, wo, stride), :]
            acc1 = acc1 + jnp.dot(patch.reshape(hw, c_in),
                                  w1_ref[kh * 3 + kw],
                                  preferred_element_type=f32)
    # bn1 (folded scale/bias) + relu
    y1 = jnp.maximum(acc1 * s1_ref[...] + b1_ref[...], 0.0)      # (hw, planes)

    # ---- stage y1 into a VMEM scratch with a zero halo for conv2 ----
    # (zero ONLY the halo; the interior is written exactly once — no redundant
    #  full-tile zero + overwrite)
    zrow = jnp.zeros((1, wo + 2, planes), f32)
    pad_scr[pl.ds(0, 1), :, :] = zrow
    pad_scr[pl.ds(ho + 1, 1), :, :] = zrow
    zcol = jnp.zeros((ho + 2, 1, planes), f32)
    pad_scr[:, pl.ds(0, 1), :] = zcol
    pad_scr[:, pl.ds(wo + 1, 1), :] = zcol
    pad_scr[pl.ds(1, ho), pl.ds(1, wo), :] = y1.reshape(ho, wo, planes)

    # ---- conv2: 3x3, stride=1, padding=1 (via the scratch halo) ----
    acc2 = jnp.zeros((hw, planes), f32)
    for kh in range(3):
        for kw in range(3):
            patch = pad_scr[pl.ds(kh, ho), pl.ds(kw, wo), :]
            acc2 = acc2 + jnp.dot(patch.reshape(hw, planes),
                                  w2_ref[kh * 3 + kw],
                                  preferred_element_type=f32)
    y2 = acc2 * s2_ref[...] + b2_ref[...]                         # (hw, planes)

    # ---- option-A shortcut fused into the residual add ----
    # original x[h, w] lives at xp[h+1, w+1]; the symmetric channel zero-pad
    # is expressed as a 0/1 projection matmul (identity when the shortcut is a
    # passthrough) — no zero-filled output region, no second HBM pass.
    sc = xp_ref[_ds(1, ho, sc_stride), _ds(1, wo, sc_stride), :]
    y2 = y2 + jnp.dot(sc.reshape(hw, c_in), proj_ref[...],
                      preferred_element_type=f32)
    out = jnp.maximum(y2, 0.0)                                    # (hw, planes)

    # store channel-major so the last (lane) axis is the widest one (H*W)
    o_ref[...] = out.T.astype(o_ref.dtype)


def basic_block_forward(x, params, *, stride=1, option="A"):
    """BasicBlock forward (inference-mode BN) as one fused Pallas kernel."""
    w1 = params["conv1_w"]          # (planes, c_in, 3, 3)  -- PyTorch OIHW
    w2 = params["conv2_w"]          # (planes, planes, 3, 3)
    n, c_in, h, w = x.shape
    planes = w1.shape[0]
    assert w1.shape == (planes, c_in, 3, 3)
    assert w2.shape == (planes, planes, 3, 3)

    eps = 1e-5

    def _fold(bn):                  # (gamma, beta, running_mean, running_var)
        gamma, beta, mean, var = bn
        scale = gamma / jnp.sqrt(var + eps)
        return (scale.astype(jnp.float32).reshape(1, planes),
                (beta - mean * scale).astype(jnp.float32).reshape(1, planes))

    s1, b1 = _fold(params["bn1"])
    s2, b2 = _fold(params["bn2"])

    # Layout plumbing in the wrapper: NCHW -> NHWC (+ 1-pixel zero halo) so the
    # kernel never strides or shifts along the lane (channel) axis.
    xp = jnp.transpose(x, (0, 2, 3, 1)).astype(jnp.float32)
    xp = jnp.pad(xp, ((0, 0), (1, 1), (1, 1), (0, 0)))
    hp, wp = h + 2, w + 2

    # Conv weights OIHW -> (9, C_in, C_out): one (C_in, C_out) matmul per tap.
    w1t = jnp.transpose(w1, (2, 3, 1, 0)).astype(jnp.float32).reshape(9, c_in, planes)
    w2t = jnp.transpose(w2, (2, 3, 1, 0)).astype(jnp.float32).reshape(9, planes, planes)

    ho = (h - 1) // stride + 1
    wo = (w - 1) // stride + 1

    if stride != 1 or c_in != planes:
        # Option-A shortcut: x[:, :, ::2, ::2] + symmetric channel zero-pad,
        # expressed as a (c_in, planes) 0/1 projection matrix.
        assert option == "A"
        # TODO(synk): option 'B' (1x1 conv + BN shortcut) is not implemented.
        pad_c = planes // 4
        assert c_in + 2 * pad_c == planes
        sc_stride = 2
        assert ho == (h + 1) // 2 and wo == (w + 1) // 2
        proj = jnp.zeros((c_in, planes), jnp.float32)
        proj = proj.at[jnp.arange(c_in), pad_c + jnp.arange(c_in)].set(1.0)
    else:
        sc_stride = 1
        proj = jnp.eye(c_in, planes, dtype=jnp.float32)

    kernel = functools.partial(
        _basic_block_kernel, stride=stride, sc_stride=sc_stride,
        ho=ho, wo=wo, c_in=c_in, planes=planes)

    out_flat = pl.pallas_call(
        kernel,
        out_shape=jax.ShapeDtypeStruct((n, planes, ho * wo), jnp.float32),
        grid=(n,),
        in_specs=[
            pl.BlockSpec((None, hp, wp, c_in), lambda i: (i, 0, 0, 0)),
            pl.BlockSpec((9, c_in, planes), lambda i: (0, 0, 0)),
            pl.BlockSpec((9, planes, planes), lambda i: (0, 0, 0)),
            pl.BlockSpec((1, planes), lambda i: (0, 0)),
            pl.BlockSpec((1, planes), lambda i: (0, 0)),
            pl.BlockSpec((1, planes), lambda i: (0, 0)),
            pl.BlockSpec((1, planes), lambda i: (0, 0)),
            pl.BlockSpec((c_in, planes), lambda i: (0, 0)),
        ],
        out_specs=pl.BlockSpec((None, planes, ho * wo), lambda i: (i, 0, 0)),
        scratch_shapes=[pltpu.VMEM((ho + 2, wo + 2, planes), jnp.float32)],
        compiler_params=pltpu.CompilerParams(
            # batch axis shards across TensorCores on multi-TC chips (v7x)
            dimension_semantics=("parallel",)),
    )(xp, w1t, w2t, s1, b1, s2, b2, proj)

    # Free metadata reshape back to NCHW.
    return out_flat.reshape(n, planes, ho, wo).astype(x.dtype)


def _reference(x, params, stride):
    """Pure-JAX reference mirroring the PyTorch BasicBlock (inference BN)."""
    w1, w2 = params["conv1_w"], params["conv2_w"]
    g1, be1, m1, v1 = params["bn1"]
    g2, be2, m2, v2 = params["bn2"]
    eps = 1e-5
    planes, c_in = w1.shape[0], w1.shape[1]

    def bn(t, g, b, m, v):
        return ((t - m[None, :, None, None])
                / jnp.sqrt(v + eps)[None, :, None, None]
                * g[None, :, None, None] + b[None, :, None, None])

    dn = ("NCHW", "OIHW", "NCHW")
    hi = jax.lax.Precision.HIGHEST
    out = jax.lax.conv_general_dilated(x, w1, (stride, stride),
                                       ((1, 1), (1, 1)),
                                       dimension_numbers=dn, precision=hi)
    out = jax.nn.relu(bn(out, g1, be1, m1, v1))
    out = jax.lax.conv_general_dilated(out, w2, (1, 1), ((1, 1), (1, 1)),
                                       dimension_numbers=dn, precision=hi)
    out = bn(out, g2, be2, m2, v2)
    if stride != 1 or c_in != planes:
        pad_c = planes // 4
        sc = jnp.pad(x[:, :, ::2, ::2],
                     ((0, 0), (pad_c, pad_c), (0, 0), (0, 0)))
    else:
        sc = x
    return jax.nn.relu(out + sc)


if __name__ == "__main__":
    key = jax.random.PRNGKey(0)
    keys = jax.random.split(key, 11)

    n, c_in, h, w = 2, 4, 16, 16
    planes, stride = 8, 2

    x = jax.random.normal(keys[0], (n, c_in, h, w), jnp.float32)
    params = {
        "conv1_w": 0.2 * jax.random.normal(keys[1], (planes, c_in, 3, 3), jnp.float32),
        "conv2_w": 0.2 * jax.random.normal(keys[2], (planes, planes, 3, 3), jnp.float32),
        "bn1": (1.0 + 0.1 * jax.random.normal(keys[3], (planes,), jnp.float32),
                0.1 * jax.random.normal(keys[4], (planes,), jnp.float32),
                0.1 * jax.random.normal(keys[5], (planes,), jnp.float32),
                jax.random.uniform(keys[6], (planes,), jnp.float32, 0.5, 1.5)),
        "bn2": (1.0 + 0.1 * jax.random.normal(keys[7], (planes,), jnp.float32),
                0.1 * jax.random.normal(keys[8], (planes,), jnp.float32),
                0.1 * jax.random.normal(keys[9], (planes,), jnp.float32),
                jax.random.uniform(keys[10], (planes,), jnp.float32, 0.5, 1.5)),
    }

    out = basic_block_forward(x, params, stride=stride)
    out = jax.block_until_ready(out)

    ref = _reference(x, params, stride)
    assert out.shape == (n, planes, h // 2, w // 2), out.shape
    assert out.dtype == x.dtype
    assert jnp.allclose(out, ref, atol=1e-2, rtol=1e-2), (
        float(jnp.max(jnp.abs(out - ref))))
    print("KERNEL_OK")
</pallas_src>

<mosaic_0001>
module attributes {stable_mosaic.version = 11 : i64} {
  func.func @_basic_block_kernel(%arg0: i32, %arg1: memref<1x18x18x4xf32, #tpu.memory_space<vmem>>, %arg2: memref<9x4x8xf32, #tpu.memory_space<vmem>>, %arg3: memref<9x8x8xf32, #tpu.memory_space<vmem>>, %arg4: memref<1x8xf32, #tpu.memory_space<vmem>>, %arg5: memref<1x8xf32, #tpu.memory_space<vmem>>, %arg6: memref<1x8xf32, #tpu.memory_space<vmem>>, %arg7: memref<1x8xf32, #tpu.memory_space<vmem>>, %arg8: memref<4x8xf32, #tpu.memory_space<vmem>>, %arg9: memref<1x8x64xf32, #tpu.memory_space<vmem>>, %arg10: memref<10x10x8xf32, #tpu.memory_space<vmem>>) attributes {dimension_semantics = [#tpu.dimension_semantics<parallel>], iteration_bounds = array<i64: 2>, scalar_prefetch = 0 : i64, scratch_operands = 1 : i64, tpu.core_type = #tpu.core_type<tc>, window_params = [{transform_indices = @transform_0, window_bounds = array<i64: 1, 18, 18, 4>}, {pipeline_mode = #tpu.pipeline_mode<synchronous>, transform_indices = @transform_1, window_bounds = array<i64: 9, 4, 8>}, {pipeline_mode = #tpu.pipeline_mode<synchronous>, transform_indices = @transform_2, window_bounds = array<i64: 9, 8, 8>}, {pipeline_mode = #tpu.pipeline_mode<synchronous>, transform_indices = @transform_3, window_bounds = array<i64: 1, 8>}, {pipeline_mode = #tpu.pipeline_mode<synchronous>, transform_indices = @transform_4, window_bounds = array<i64: 1, 8>}, {pipeline_mode = #tpu.pipeline_mode<synchronous>, transform_indices = @transform_5, window_bounds = array<i64: 1, 8>}, {pipeline_mode = #tpu.pipeline_mode<synchronous>, transform_indices = @transform_6, window_bounds = array<i64: 1, 8>}, {pipeline_mode = #tpu.pipeline_mode<synchronous>, transform_indices = @transform_7, window_bounds = array<i64: 4, 8>}, {transform_indices = @transform_8, window_bounds = array<i64: 1, 8, 64>}]} {
    %cst = arith.constant 0.000000e+00 : f32
    %0 = vector.broadcast %cst : f32 to vector<64x8xf32>
    %c0 = arith.constant 0 : index
    %c0_0 = arith.constant 0 : index
    %c0_1 = arith.constant 0 : index
    %c0_2 = arith.constant 0 : index
    %1 = tpu.strided_load %arg1[%c0, %c0_0, %c0_1, %c0_2] {strides = array<i32: 1, 2, 2, 1>} : memref<1x18x18x4xf32, #tpu.memory_space<vmem>>, vector<1x8x8x4xf32>
    %2 = vector.shape_cast %1 : vector<1x8x8x4xf32> to vector<8x8x4xf32>
    %3 = vector.shape_cast %2 : vector<8x8x4xf32> to vector<64x4xf32>
    %c0_3 = arith.constant 0 : index
    %c0_4 = arith.constant 0 : index
    %c0_5 = arith.constant 0 : index
    %4 = vector.load %arg2[%c0_3, %c0_4, %c0_5] : memref<9x4x8xf32, #tpu.memory_space<vmem>>, vector<1x4x8xf32>
    %5 = vector.shape_cast %4 : vector<1x4x8xf32> to vector<4x8xf32>
    %cst_6 = arith.constant dense<0.000000e+00> : vector<64x8xf32>
    %6 = tpu.matmul %3, %5, %cst_6 {dimension_numbers = #tpu.dot_dimension_numbers<[1], [0], [0], [1], [0, 0, 1, 1], [], []>} : vector<64x4xf32>, vector<4x8xf32>, vector<64x8xf32> -> vector<64x8xf32>
    %7 = arith.addf %0, %6 : vector<64x8xf32>
    %c0_7 = arith.constant 0 : index
    %c0_8 = arith.constant 0 : index
    %c1 = arith.constant 1 : index
    %c0_9 = arith.constant 0 : index
    %8 = tpu.strided_load %arg1[%c0_7, %c0_8, %c1, %c0_9] {strides = array<i32: 1, 2, 2, 1>} : memref<1x18x18x4xf32, #tpu.memory_space<vmem>>, vector<1x8x8x4xf32>
    %9 = vector.shape_cast %8 : vector<1x8x8x4xf32> to vector<8x8x4xf32>
    %10 = vector.shape_cast %9 : vector<8x8x4xf32> to vector<64x4xf32>
    %c1_10 = arith.constant 1 : index
    %c0_11 = arith.constant 0 : index
    %c0_12 = arith.constant 0 : index
    %11 = vector.load %arg2[%c1_10, %c0_11, %c0_12] : memref<9x4x8xf32, #tpu.memory_space<vmem>>, vector<1x4x8xf32>
    %12 = vector.shape_cast %11 : vector<1x4x8xf32> to vector<4x8xf32>
    %cst_13 = arith.constant dense<0.000000e+00> : vector<64x8xf32>
    %13 = tpu.matmul %10, %12, %cst_13 {dimension_numbers = #tpu.dot_dimension_numbers<[1], [0], [0], [1], [0, 0, 1, 1], [], []>} : vector<64x4xf32>, vector<4x8xf32>, vector<64x8xf32> -> vector<64x8xf32>
    %14 = arith.addf %7, %13 : vector<64x8xf32>
    %c0_14 = arith.constant 0 : index
    %c0_15 = arith.constant 0 : index
    %c2 = arith.constant 2 : index
    %c0_16 = arith.constant 0 : index
    %15 = tpu.strided_load %arg1[%c0_14, %c0_15, %c2, %c0_16] {strides = array<i32: 1, 2, 2, 1>} : memref<1x18x18x4xf32, #tpu.memory_space<vmem>>, vector<1x8x8x4xf32>
    %16 = vector.shape_cast %15 : vector<1x8x8x4xf32> to vector<8x8x4xf32>
    %17 = vector.shape_cast %16 : vector<8x8x4xf32> to vector<64x4xf32>
    %c2_17 = arith.constant 2 : index
    %c0_18 = arith.constant 0 : index
    %c0_19 = arith.constant 0 : index
    %18 = vector.load %arg2[%c2_17, %c0_18, %c0_19] : memref<9x4x8xf32, #tpu.memory_space<vmem>>, vector<1x4x8xf32>
    %19 = vector.shape_cast %18 : vector<1x4x8xf32> to vector<4x8xf32>
    %cst_20 = arith.constant dense<0.000000e+00> : vector<64x8xf32>
    %20 = tpu.matmul %17, %19, %cst_20 {dimension_numbers = #tpu.dot_dimension_numbers<[1], [0], [0], [1], [0, 0, 1, 1], [], []>} : vector<64x4xf32>, vector<4x8xf32>, vector<64x8xf32> -> vector<64x8xf32>
    %21 = arith.addf %14, %20 : vector<64x8xf32>
    %c0_21 = arith.constant 0 : index
    %c1_22 = arith.constant 1 : index
    %c0_23 = arith.constant 0 : index
    %c0_24 = arith.constant 0 : index
    %22 = tpu.strided_load %arg1[%c0_21, %c1_22, %c0_23, %c0_24] {strides = array<i32: 1, 2, 2, 1>} : memref<1x18x18x4xf32, #tpu.memory_space<vmem>>, vector<1x8x8x4xf32>
    %23 = vector.shape_cast %22 : vector<1x8x8x4xf32> to vector<8x8x4xf32>
    %24 = vector.shape_cast %23 : vector<8x8x4xf32> to vector<64x4xf32>
    %c3 = arith.constant 3 : index
    %c0_25 = arith.constant 0 : index
    %c0_26 = arith.constant 0 : index
    %25 = vector.load %arg2[%c3, %c0_25, %c0_26] : memref<9x4x8xf32, #tpu.memory_space<vmem>>, vector<1x4x8xf32>
    %26 = vector.shape_cast %25 : vector<1x4x8xf32> to vector<4x8xf32>
    %cst_27 = arith.constant dense<0.000000e+00> : vector<64x8xf32>
    %27 = tpu.matmul %24, %26, %cst_27 {dimension_numbers = #tpu.dot_dimension_numbers<[1], [0], [0], [1], [0, 0, 1, 1], [], []>} : vector<64x4xf32>, vector<4x8xf32>, vector<64x8xf32> -> vector<64x8xf32>
    %28 = arith.addf %21, %27 : vector<64x8xf32>
    %c0_28 = arith.constant 0 : index
    %c1_29 = arith.constant 1 : index
    %c1_30 = arith.constant 1 : index
    %c0_31 = arith.constant 0 : index
    %29 = tpu.strided_load %arg1[%c0_28, %c1_29, %c1_30, %c0_31] {strides = array<i32: 1, 2, 2, 1>} : memref<1x18x18x4xf32, #tpu.memory_space<vmem>>, vector<1x8x8x4xf32>
    %30 = vector.shape_cast %29 : vector<1x8x8x4xf32> to vector<8x8x4xf32>
    %31 = vector.shape_cast %30 : vector<8x8x4xf32> to vector<64x4xf32>
    %c4 = arith.constant 4 : index
    %c0_32 = arith.constant 0 : index
    %c0_33 = arith.constant 0 : index
    %32 = vector.load %arg2[%c4, %c0_32, %c0_33] : memref<9x4x8xf32, #tpu.memory_space<vmem>>, vector<1x4x8xf32>
    %33 = vector.shape_cast %32 : vector<1x4x8xf32> to vector<4x8xf32>
    %cst_34 = arith.constant dense<0.000000e+00> : vector<64x8xf32>
    %34 = tpu.matmul %31, %33, %cst_34 {dimension_numbers = #tpu.dot_dimension_numbers<[1], [0], [0], [1], [0, 0, 1, 1], [], []>} : vector<64x4xf32>, vector<4x8xf32>, vector<64x8xf32> -> vector<64x8xf32>
    %35 = arith.addf %28, %34 : vector<64x8xf32>
    %c0_35 = arith.constant 0 : index
    %c1_36 = arith.constant 1 : index
    %c2_37 = arith.constant 2 : index
    %c0_38 = arith.constant 0 : index
    %36 = tpu.strided_load %arg1[%c0_35, %c1_36, %c2_37, %c0_38] {strides = array<i32: 1, 2, 2, 1>} : memref<1x18x18x4xf32, #tpu.memory_space<vmem>>, vector<1x8x8x4xf32>
    %37 = vector.shape_cast %36 : vector<1x8x8x4xf32> to vector<8x8x4xf32>
    %38 = vector.shape_cast %37 : vector<8x8x4xf32> to vector<64x4xf32>
    %c5 = arith.constant 5 : index
    %c0_39 = arith.constant 0 : index
    %c0_40 = arith.constant 0 : index
    %39 = vector.load %arg2[%c5, %c0_39, %c0_40] : memref<9x4x8xf32, #tpu.memory_space<vmem>>, vector<1x4x8xf32>
    %40 = vector.shape_cast %39 : vector<1x4x8xf32> to vector<4x8xf32>
    %cst_41 = arith.constant dense<0.000000e+00> : vector<64x8xf32>
    %41 = tpu.matmul %38, %40, %cst_41 {dimension_numbers = #tpu.dot_dimension_numbers<[1], [0], [0], [1], [0, 0, 1, 1], [], []>} : vector<64x4xf32>, vector<4x8xf32>, vector<64x8xf32> -> vector<64x8xf32>
    %42 = arith.addf %35, %41 : vector<64x8xf32>
    %c0_42 = arith.constant 0 : index
    %c2_43 = arith.constant 2 : index
    %c0_44 = arith.constant 0 : index
    %c0_45 = arith.constant 0 : index
    %43 = tpu.strided_load %arg1[%c0_42, %c2_43, %c0_44, %c0_45] {strides = array<i32: 1, 2, 2, 1>} : memref<1x18x18x4xf32, #tpu.memory_space<vmem>>, vector<1x8x8x4xf32>
    %44 = vector.shape_cast %43 : vector<1x8x8x4xf32> to vector<8x8x4xf32>
    %45 = vector.shape_cast %44 : vector<8x8x4xf32> to vector<64x4xf32>
    %c6 = arith.constant 6 : index
    %c0_46 = arith.constant 0 : index
    %c0_47 = arith.constant 0 : index
    %46 = vector.load %arg2[%c6, %c0_46, %c0_47] : memref<9x4x8xf32, #tpu.memory_space<vmem>>, vector<1x4x8xf32>
    %47 = vector.shape_cast %46 : vector<1x4x8xf32> to vector<4x8xf32>
    %cst_48 = arith.constant dense<0.000000e+00> : vector<64x8xf32>
    %48 = tpu.matmul %45, %47, %cst_48 {dimension_numbers = #tpu.dot_dimension_numbers<[1], [0], [0], [1], [0, 0, 1, 1], [], []>} : vector<64x4xf32>, vector<4x8xf32>, vector<64x8xf32> -> vector<64x8xf32>
    %49 = arith.addf %42, %48 : vector<64x8xf32>
    %c0_49 = arith.constant 0 : index
    %c2_50 = arith.constant 2 : index
    %c1_51 = arith.constant 1 : index
    %c0_52 = arith.constant 0 : index
    %50 = tpu.strided_load %arg1[%c0_49, %c2_50, %c1_51, %c0_52] {strides = array<i32: 1, 2, 2, 1>} : memref<1x18x18x4xf32, #tpu.memory_space<vmem>>, vector<1x8x8x4xf32>
    %51 = vector.shape_cast %50 : vector<1x8x8x4xf32> to vector<8x8x4xf32>
    %52 = vector.shape_cast %51 : vector<8x8x4xf32> to vector<64x4xf32>
    %c7 = arith.constant 7 : index
    %c0_53 = arith.constant 0 : index
    %c0_54 = arith.constant 0 : index
    %53 = vector.load %arg2[%c7, %c0_53, %c0_54] : memref<9x4x8xf32, #tpu.memory_space<vmem>>, vector<1x4x8xf32>
    %54 = vector.shape_cast %53 : vector<1x4x8xf32> to vector<4x8xf32>
    %cst_55 = arith.constant dense<0.000000e+00> : vector<64x8xf32>
    %55 = tpu.matmul %52, %54, %cst_55 {dimension_numbers = #tpu.dot_dimension_numbers<[1], [0], [0], [1], [0, 0, 1, 1], [], []>} : vector<64x4xf32>, vector<4x8xf32>, vector<64x8xf32> -> vector<64x8xf32>
    %56 = arith.addf %49, %55 : vector<64x8xf32>
    %c0_56 = arith.constant 0 : index
    %c2_57 = arith.constant 2 : index
    %c2_58 = arith.constant 2 : index
    %c0_59 = arith.constant 0 : index
    %57 = tpu.strided_load %arg1[%c0_56, %c2_57, %c2_58, %c0_59] {strides = array<i32: 1, 2, 2, 1>} : memref<1x18x18x4xf32, #tpu.memory_space<vmem>>, vector<1x8x8x4xf32>
    %58 = vector.shape_cast %57 : vector<1x8x8x4xf32> to vector<8x8x4xf32>
    %59 = vector.shape_cast %58 : vector<8x8x4xf32> to vector<64x4xf32>
    %c8 = arith.constant 8 : index
    %c0_60 = arith.constant 0 : index
    %c0_61 = arith.constant 0 : index
    %60 = vector.load %arg2[%c8, %c0_60, %c0_61] : memref<9x4x8xf32, #tpu.memory_space<vmem>>, vector<1x4x8xf32>
    %61 = vector.shape_cast %60 : vector<1x4x8xf32> to vector<4x8xf32>
    %cst_62 = arith.constant dense<0.000000e+00> : vector<64x8xf32>
    %62 = tpu.matmul %59, %61, %cst_62 {dimension_numbers = #tpu.dot_dimension_numbers<[1], [0], [0], [1], [0, 0, 1, 1], [], []>} : vector<64x4xf32>, vector<4x8xf32>, vector<64x8xf32> -> vector<64x8xf32>
    %63 = arith.addf %56, %62 : vector<64x8xf32>
    %c0_63 = arith.constant 0 : index
    %c0_64 = arith.constant 0 : index
    %64 = vector.load %arg4[%c0_63, %c0_64] : memref<1x8xf32, #tpu.memory_space<vmem>>, vector<1x8xf32>
    %65 = vector.broadcast %64 : vector<1x8xf32> to vector<64x8xf32>
    %66 = arith.mulf %63, %65 : vector<64x8xf32>
    %c0_65 = arith.constant 0 : index
    %c0_66 = arith.constant 0 : index
    %67 = vector.load %arg5[%c0_65, %c0_66] : memref<1x8xf32, #tpu.memory_space<vmem>>, vector<1x8xf32>
    %68 = vector.broadcast %67 : vector<1x8xf32> to vector<64x8xf32>
    %69 = arith.addf %66, %68 : vector<64x8xf32>
    %cst_67 = arith.constant 0.000000e+00 : f32
    %70 = vector.broadcast %cst_67 : f32 to vector<64x8xf32>
    %71 = arith.maximumf %69, %70 : vector<64x8xf32>
    %cst_68 = arith.constant 0.000000e+00 : f32
    %72 = vector.broadcast %cst_68 : f32 to vector<1x10x8xf32>
    %c0_69 = arith.constant 0 : index
    %c0_70 = arith.constant 0 : index
    %c0_71 = arith.constant 0 : index
    %73 = vector.load %arg10[%c0_69, %c0_70, %c0_71] : memref<10x10x8xf32, #tpu.memory_space<vmem>>, vector<1x10x8xf32>
    tpu.vector_store %arg10[%c0_69, %c0_70, %c0_71], %72 {strides = array<i32>} : memref<10x10x8xf32, #tpu.memory_space<vmem>>, vector<1x10x8xf32>,
    %c9 = arith.constant 9 : index
    %c0_72 = arith.constant 0 : index
    %c0_73 = arith.constant 0 : index
    %74 = vector.load %arg10[%c9, %c0_72, %c0_73] : memref<10x10x8xf32, #tpu.memory_space<vmem>>, vector<1x10x8xf32>
    tpu.vector_store %arg10[%c9, %c0_72, %c0_73], %72 {strides = array<i32>} : memref<10x10x8xf32, #tpu.memory_space<vmem>>, vector<1x10x8xf32>,
    %cst_74 = arith.constant 0.000000e+00 : f32
    %75 = vector.broadcast %cst_74 : f32 to vector<10x1x8xf32>
    %c0_75 = arith.constant 0 : index
    %c0_76 = arith.constant 0 : index
    %c0_77 = arith.constant 0 : index
    %76 = vector.load %arg10[%c0_75, %c0_76, %c0_77] : memref<10x10x8xf32, #tpu.memory_space<vmem>>, vector<10x1x8xf32>
    tpu.vector_store %arg10[%c0_75, %c0_76, %c0_77], %75 {strides = array<i32>} : memref<10x10x8xf32, #tpu.memory_space<vmem>>, vector<10x1x8xf32>,
    %c0_78 = arith.constant 0 : index
    %c9_79 = arith.constant 9 : index
    %c0_80 = arith.constant 0 : index
    %77 = vector.load %arg10[%c0_78, %c9_79, %c0_80] : memref<10x10x8xf32, #tpu.memory_space<vmem>>, vector<10x1x8xf32>
    tpu.vector_store %arg10[%c0_78, %c9_79, %c0_80], %75 {strides = array<i32>} : memref<10x10x8xf32, #tpu.memory_space<vmem>>, vector<10x1x8xf32>,
    %78 = vector.shape_cast %71 : vector<64x8xf32> to vector<8x8x8xf32>
    %c1_81 = arith.constant 1 : index
    %c1_82 = arith.constant 1 : index
    %c0_83 = arith.constant 0 : index
    %79 = vector.load %arg10[%c1_81, %c1_82, %c0_83] : memref<10x10x8xf32, #tpu.memory_space<vmem>>, vector<8x8x8xf32>
    tpu.vector_store %arg10[%c1_81, %c1_82, %c0_83], %78 {strides = array<i32>} : memref<10x10x8xf32, #tpu.memory_space<vmem>>, vector<8x8x8xf32>,
    %cst_84 = arith.constant 0.000000e+00 : f32
    %80 = vector.broadcast %cst_84 : f32 to vector<64x8xf32>
    %c0_85 = arith.constant 0 : index
    %c0_86 = arith.constant 0 : index
    %c0_87 = arith.constant 0 : index
    %81 = vector.load %arg10[%c0_85, %c0_86, %c0_87] : memref<10x10x8xf32, #tpu.memory_space<vmem>>, vector<8x8x8xf32>
    %82 = vector.shape_cast %81 : vector<8x8x8xf32> to vector<64x8xf32>
    %c0_88 = arith.constant 0 : index
    %c0_89 = arith.constant 0 : index
    %c0_90 = arith.constant 0 : index
    %83 = vector.load %arg3[%c0_88, %c0_89, %c0_90] : memref<9x8x8xf32, #tpu.memory_space<vmem>>, vector<1x8x8xf32>
    %84 = vector.shape_cast %83 : vector<1x8x8xf32> to vector<8x8xf32>
    %cst_91 = arith.constant dense<0.000000e+00> : vector<64x8xf32>
    %85 = tpu.matmul %82, %84, %cst_91 {dimension_numbers = #tpu.dot_dimension_numbers<[1], [0], [0], [1], [0, 0, 1, 1], [], []>} : vector<64x8xf32>, vector<8x8xf32>, vector<64x8xf32> -> vector<64x8xf32>
    %86 = arith.addf %80, %85 : vector<64x8xf32>
    %c0_92 = arith.constant 0 : index
    %c1_93 = arith.constant 1 : index
    %c0_94 = arith.constant 0 : index
    %87 = vector.load %arg10[%c0_92, %c1_93, %c0_94] : memref<10x10x8xf32, #tpu.memory_space<vmem>>, vector<8x8x8xf32>
    %88 = vector.shape_cast %87 : vector<8x8x8xf32> to vector<64x8xf32>
    %c1_95 = arith.constant 1 : index
    %c0_96 = arith.constant 0 : index
    %c0_97 = arith.constant 0 : index
    %89 = vector.load %arg3[%c1_95, %c0_96, %c0_97] : memref<9x8x8xf32, #tpu.memory_space<vmem>>, vector<1x8x8xf32>
    %90 = vector.shape_cast %89 : vector<1x8x8xf32> to vector<8x8xf32>
    %cst_98 = arith.constant dense<0.000000e+00> : vector<64x8xf32>
    %91 = tpu.matmul %88, %90, %cst_98 {dimension_numbers = #tpu.dot_dimension_numbers<[1], [0], [0], [1], [0, 0, 1, 1], [], []>} : vector<64x8xf32>, vector<8x8xf32>, vector<64x8xf32> -> vector<64x8xf32>
    %92 = arith.addf %86, %91 : vector<64x8xf32>
    %c0_99 = arith.constant 0 : index
    %c2_100 = arith.constant 2 : index
    %c0_101 = arith.constant 0 : index
    %93 = vector.load %arg10[%c0_99, %c2_100, %c0_101] : memref<10x10x8xf32, #tpu.memory_space<vmem>>, vector<8x8x8xf32>
    %94 = vector.shape_cast %93 : vector<8x8x8xf32> to vector<64x8xf32>
    %c2_102 = arith.constant 2 : index
    %c0_103 = arith.constant 0 : index
    %c0_104 = arith.constant 0 : index
    %95 = vector.load %arg3[%c2_102, %c0_103, %c0_104] : memref<9x8x8xf32, #tpu.memory_space<vmem>>, vector<1x8x8xf32>
    %96 = vector.shape_cast %95 : vector<1x8x8xf32> to vector<8x8xf32>
    %cst_105 = arith.constant dense<0.000000e+00> : vector<64x8xf32>
    %97 = tpu.matmul %94, %96, %cst_105 {dimension_numbers = #tpu.dot_dimension_numbers<[1], [0], [0], [1], [0, 0, 1, 1], [], []>} : vector<64x8xf32>, vector<8x8xf32>, vector<64x8xf32> -> vector<64x8xf32>
    %98 = arith.addf %92, %97 : vector<64x8xf32>
    %c1_106 = arith.constant 1 : index
    %c0_107 = arith.constant 0 : index
    %c0_108 = arith.constant 0 : index
    %99 = vector.load %arg10[%c1_106, %c0_107, %c0_108] : memref<10x10x8xf32, #tpu.memory_space<vmem>>, vector<8x8x8xf32>
    %100 = vector.shape_cast %99 : vector<8x8x8xf32> to vector<64x8xf32>
    %c3_109 = arith.constant 3 : index
    %c0_110 = arith.constant 0 : index
    %c0_111 = arith.constant 0 : index
    %101 = vector.load %arg3[%c3_109, %c0_110, %c0_111] : memref<9x8x8xf32, #tpu.memory_space<vmem>>, vector<1x8x8xf32>
    %102 = vector.shape_cast %101 : vector<1x8x8xf32> to vector<8x8xf32>
    %cst_112 = arith.constant dense<0.000000e+00> : vector<64x8xf32>
    %103 = tpu.matmul %100, %102, %cst_112 {dimension_numbers = #tpu.dot_dimension_numbers<[1], [0], [0], [1], [0, 0, 1, 1], [], []>} : vector<64x8xf32>, vector<8x8xf32>, vector<64x8xf32> -> vector<64x8xf32>
    %104 = arith.addf %98, %103 : vector<64x8xf32>
    %c1_113 = arith.constant 1 : index
    %c1_114 = arith.constant 1 : index
    %c0_115 = arith.constant 0 : index
    %105 = vector.load %arg10[%c1_113, %c1_114, %c0_115] : memref<10x10x8xf32, #tpu.memory_space<vmem>>, vector<8x8x8xf32>
    %106 = vector.shape_cast %105 : vector<8x8x8xf32> to vector<64x8xf32>
    %c4_116 = arith.constant 4 : index
    %c0_117 = arith.constant 0 : index
    %c0_118 = arith.constant 0 : index
    %107 = vector.load %arg3[%c4_116, %c0_117, %c0_118] : memref<9x8x8xf32, #tpu.memory_space<vmem>>, vector<1x8x8xf32>
    %108 = vector.shape_cast %107 : vector<1x8x8xf32> to vector<8x8xf32>
    %cst_119 = arith.constant dense<0.000000e+00> : vector<64x8xf32>
    %109 = tpu.matmul %106, %108, %cst_119 {dimension_numbers = #tpu.dot_dimension_numbers<[1], [0], [0], [1], [0, 0, 1, 1], [], []>} : vector<64x8xf32>, vector<8x8xf32>, vector<64x8xf32> -> vector<64x8xf32>
    %110 = arith.addf %104, %109 : vector<64x8xf32>
    %c1_120 = arith.constant 1 : index
    %c2_121 = arith.constant 2 : index
    %c0_122 = arith.constant 0 : index
    %111 = vector.load %arg10[%c1_120, %c2_121, %c0_122] : memref<10x10x8xf32, #tpu.memory_space<vmem>>, vector<8x8x8xf32>
    %112 = vector.shape_cast %111 : vector<8x8x8xf32> to vector<64x8xf32>
    %c5_123 = arith.constant 5 : index
    %c0_124 = arith.constant 0 : index
    %c0_125 = arith.constant 0 : index
    %113 = vector.load %arg3[%c5_123, %c0_124, %c0_125] : memref<9x8x8xf32, #tpu.memory_space<vmem>>, vector<1x8x8xf32>
    %114 = vector.shape_cast %113 : vector<1x8x8xf32> to vector<8x8xf32>
    %cst_126 = arith.constant dense<0.000000e+00> : vector<64x8xf32>
    %115 = tpu.matmul %112, %114, %cst_126 {dimension_numbers = #tpu.dot_dimension_numbers<[1], [0], [0], [1], [0, 0, 1, 1], [], []>} : vector<64x8xf32>, vector<8x8xf32>, vector<64x8xf32> -> vector<64x8xf32>
    %116 = arith.addf %110, %115 : vector<64x8xf32>
    %c2_127 = arith.constant 2 : index
    %c0_128 = arith.constant 0 : index
    %c0_129 = arith.constant 0 : index
    %117 = vector.load %arg10[%c2_127, %c0_128, %c0_129] : memref<10x10x8xf32, #tpu.memory_space<vmem>>, vector<8x8x8xf32>
    %118 = vector.shape_cast %117 : vector<8x8x8xf32> to vector<64x8xf32>
    %c6_130 = arith.constant 6 : index
    %c0_131 = arith.constant 0 : index
    %c0_132 = arith.constant 0 : index
    %119 = vector.load %arg3[%c6_130, %c0_131, %c0_132] : memref<9x8x8xf32, #tpu.memory_space<vmem>>, vector<1x8x8xf32>
    %120 = vector.shape_cast %119 : vector<1x8x8xf32> to vector<8x8xf32>
    %cst_133 = arith.constant dense<0.000000e+00> : vector<64x8xf32>
    %121 = tpu.matmul %118, %120, %cst_133 {dimension_numbers = #tpu.dot_dimension_numbers<[1], [0], [0], [1], [0, 0, 1, 1], [], []>} : vector<64x8xf32>, vector<8x8xf32>, vector<64x8xf32> -> vector<64x8xf32>
    %122 = arith.addf %116, %121 : vector<64x8xf32>
    %c2_134 = arith.constant 2 : index
    %c1_135 = arith.constant 1 : index
    %c0_136 = arith.constant 0 : index
    %123 = vector.load %arg10[%c2_134, %c1_135, %c0_136] : memref<10x10x8xf32, #tpu.memory_space<vmem>>, vector<8x8x8xf32>
    %124 = vector.shape_cast %123 : vector<8x8x8xf32> to vector<64x8xf32>
    %c7_137 = arith.constant 7 : index
    %c0_138 = arith.constant 0 : index
    %c0_139 = arith.constant 0 : index
    %125 = vector.load %arg3[%c7_137, %c0_138, %c0_139] : memref<9x8x8xf32, #tpu.memory_space<vmem>>, vector<1x8x8xf32>
    %126 = vector.shape_cast %125 : vector<1x8x8xf32> to vector<8x8xf32>
    %cst_140 = arith.constant dense<0.000000e+00> : vector<64x8xf32>
    %127 = tpu.matmul %124, %126, %cst_140 {dimension_numbers = #tpu.dot_dimension_numbers<[1], [0], [0], [1], [0, 0, 1, 1], [], []>} : vector<64x8xf32>, vector<8x8xf32>, vector<64x8xf32> -> vector<64x8xf32>
    %128 = arith.addf %122, %127 : vector<64x8xf32>
    %c2_141 = arith.constant 2 : index
    %c2_142 = arith.constant 2 : index
    %c0_143 = arith.constant 0 : index
    %129 = vector.load %arg10[%c2_141, %c2_142, %c0_143] : memref<10x10x8xf32, #tpu.memory_space<vmem>>, vector<8x8x8xf32>
    %130 = vector.shape_cast %129 : vector<8x8x8xf32> to vector<64x8xf32>
    %c8_144 = arith.constant 8 : index
    %c0_145 = arith.constant 0 : index
    %c0_146 = arith.constant 0 : index
    %131 = vector.load %arg3[%c8_144, %c0_145, %c0_146] : memref<9x8x8xf32, #tpu.memory_space<vmem>>, vector<1x8x8xf32>
    %132 = vector.shape_cast %131 : vector<1x8x8xf32> to vector<8x8xf32>
    %cst_147 = arith.constant dense<0.000000e+00> : vector<64x8xf32>
    %133 = tpu.matmul %130, %132, %cst_147 {dimension_numbers = #tpu.dot_dimension_numbers<[1], [0], [0], [1], [0, 0, 1, 1], [], []>} : vector<64x8xf32>, vector<8x8xf32>, vector<64x8xf32> -> vector<64x8xf32>
    %134 = arith.addf %128, %133 : vector<64x8xf32>
    %c0_148 = arith.constant 0 : index
    %c0_149 = arith.constant 0 : index
    %135 = vector.load %arg6[%c0_148, %c0_149] : memref<1x8xf32, #tpu.memory_space<vmem>>, vector<1x8xf32>
    %136 = vector.broadcast %135 : vector<1x8xf32> to vector<64x8xf32>
    %137 = arith.mulf %134, %136 : vector<64x8xf32>
    %c0_150 = arith.constant 0 : index
    %c0_151 = arith.constant 0 : index
    %138 = vector.load %arg7[%c0_150, %c0_151] : memref<1x8xf32, #tpu.memory_space<vmem>>, vector<1x8xf32>
    %139 = vector.broadcast %138 : vector<1x8xf32> to vector<64x8xf32>
    %140 = arith.addf %137, %139 : vector<64x8xf32>
    %c0_152 = arith.constant 0 : index
    %c1_153 = arith.constant 1 : index
    %c1_154 = arith.constant 1 : index
    %c0_155 = arith.constant 0 : index
    %141 = tpu.strided_load %arg1[%c0_152, %c1_153, %c1_154, %c0_155] {strides = array<i32: 1, 2, 2, 1>} : memref<1x18x18x4xf32, #tpu.memory_space<vmem>>, vector<1x8x8x4xf32>
    %142 = vector.shape_cast %141 : vector<1x8x8x4xf32> to vector<8x8x4xf32>
    %143 = vector.shape_cast %142 : vector<8x8x4xf32> to vector<64x4xf32>
    %c0_156 = arith.constant 0 : index
    %c0_157 = arith.constant 0 : index
    %144 = vector.load %arg8[%c0_156, %c0_157] : memref<4x8xf32, #tpu.memory_space<vmem>>, vector<4x8xf32>
    %cst_158 = arith.constant dense<0.000000e+00> : vector<64x8xf32>
    %145 = tpu.matmul %143, %144, %cst_158 {dimension_numbers = #tpu.dot_dimension_numbers<[1], [0], [0], [1], [0, 0, 1, 1], [], []>} : vector<64x4xf32>, vector<4x8xf32>, vector<64x8xf32> -> vector<64x8xf32>
    %146 = arith.addf %140, %145 : vector<64x8xf32>
    %cst_159 = arith.constant 0.000000e+00 : f32
    %147 = vector.broadcast %cst_159 : f32 to vector<64x8xf32>
    %148 = arith.maximumf %146, %147 : vector<64x8xf32>
    %149 = tpu.transpose %148, [1, 0] : vector<64x8xf32> -> vector<8x64xf32>
    %c0_160 = arith.constant 0 : index
    %c0_161 = arith.constant 0 : index
    %c0_162 = arith.constant 0 : index
    %150 = vector.load %arg9[%c0_160, %c0_161, %c0_162] : memref<1x8x64xf32, #tpu.memory_space<vmem>>, vector<1x8x64xf32>
    %151 = vector.shape_cast %150 : vector<1x8x64xf32> to vector<8x64xf32>
    %152 = vector.shape_cast %149 : vector<8x64xf32> to vector<1x8x64xf32>
    tpu.vector_store %arg9[%c0_160, %c0_161, %c0_162], %152 {strides = array<i32>} : memref<1x8x64xf32, #tpu.memory_space<vmem>>, vector<1x8x64xf32>,
    return
  }
  func.func @transform_0(%arg0: i32) -> (i32, i32, i32, i32) {
    %c0_i32 = arith.constant 0 : i32
    %c0_i32_0 = arith.constant 0 : i32
    %c0_i32_1 = arith.constant 0 : i32
    %c0_i32_2 = arith.constant 0 : i32
    return %arg0, %c0_i32, %c0_i32_0, %c0_i32_1 : i32, i32, i32, i32
  }
  func.func @transform_1(%arg0: i32) -> (i32, i32, i32) {
    %c0_i32 = arith.constant 0 : i32
    %c0_i32_0 = arith.constant 0 : i32
    %c0_i32_1 = arith.constant 0 : i32
    %c0_i32_2 = arith.constant 0 : i32
    return %c0_i32, %c0_i32_0, %c0_i32_1 : i32, i32, i32
  }
  func.func @transform_2(%arg0: i32) -> (i32, i32, i32) {
    %c0_i32 = arith.constant 0 : i32
    %c0_i32_0 = arith.constant 0 : i32
    %c0_i32_1 = arith.constant 0 : i32
    %c0_i32_2 = arith.constant 0 : i32
    return %c0_i32, %c0_i32_0, %c0_i32_1 : i32, i32, i32
  }
  func.func @transform_3(%arg0: i32) -> (i32, i32) {
    %c0_i32 = arith.constant 0 : i32
    %c0_i32_0 = arith.constant 0 : i32
    %c0_i32_1 = arith.constant 0 : i32
    return %c0_i32, %c0_i32_0 : i32, i32
  }
  func.func @transform_4(%arg0: i32) -> (i32, i32) {
    %c0_i32 = arith.constant 0 : i32
    %c0_i32_0 = arith.constant 0 : i32
    %c0_i32_1 = arith.constant 0 : i32
    return %c0_i32, %c0_i32_0 : i32, i32
  }
  func.func @transform_5(%arg0: i32) -> (i32, i32) {
    %c0_i32 = arith.constant 0 : i32
    %c0_i32_0 = arith.constant 0 : i32
    %c0_i32_1 = arith.constant 0 : i32
    return %c0_i32, %c0_i32_0 : i32, i32
  }
  func.func @transform_6(%arg0: i32) -> (i32, i32) {
    %c0_i32 = arith.constant 0 : i32
    %c0_i32_0 = arith.constant 0 : i32
    %c0_i32_1 = arith.constant 0 : i32
    return %c0_i32, %c0_i32_0 : i32, i32
  }
  func.func @transform_7(%arg0: i32) -> (i32, i32) {
    %c0_i32 = arith.constant 0 : i32
    %c0_i32_0 = arith.constant 0 : i32
    %c0_i32_1 = arith.constant 0 : i32
    return %c0_i32, %c0_i32_0 : i32, i32
  }
  func.func @transform_8(%arg0: i32) -> (i32, i32, i32) {
    %c0_i32 = arith.constant 0 : i32
    %c0_i32_0 = arith.constant 0 : i32
    %c0_i32_1 = arith.constant 0 : i32
    return %arg0, %c0_i32, %c0_i32_0 : i32, i32, i32
  }
}

</mosaic_0001>

<bundles_post_ra>
// kernel: tpu_custom_call.1
= control target key start
LH: loop header
LB: loop body
LE: loop exit
PB: predicated region body
PF: predicated region fallthrough
CT: control target
= control target key end

     0   :  { %13 = vsyncpa [#allocation4], 0  ;;  %s4971_s0 = inlined_call_operand.vmem [shape: f32[2,18,18,4], index: 0, kind: input, shape index: {}]   ;;  %s4972_s1 = inlined_call_operand.vmem [shape: f32[9,4,8], index: 1, kind: input, shape index: {}]   ;;  %s4973_s2 = inlined_call_operand.vmem [shape: f32[9,8,8], index: 2, kind: input, shape index: {}]   ;;  %s4974_s3 = inlined_call_operand.vmem [shape: f32[1,8], index: 3, kind: input, shape index: {}]   ;;  %s4975_s4 = inlined_call_operand.vmem [shape: f32[1,8], index: 4, kind: input, shape index: {}]   ;;  %s4976_s5 = inlined_call_operand.vmem [shape: f32[1,8], index: 5, kind: input, shape index: {}]   ;;  %s4977_s6 = inlined_call_operand.vmem [shape: f32[1,8], index: 6, kind: input, shape index: {}]   ;;  %s4978_s7 = inlined_call_operand.vmem [shape: f32[4,8], index: 7, kind: input, shape index: {}]   ;;  %s4979_s8 = inlined_call_operand.hbm [shape: f32[2,8,64], index: 8, kind: output, shape index: {}]  }
   0x1   :  { %15 = vsyncpa [#allocation4 + $0x1], 0  ;;  %s4422_s27 = smov 0   ;;  %s4424_s28 = smov 0  }
   0x2   :  { %s4426_s29 = smov 0   ;;  %s4428_s30 = smov 0  }
   0x3 LB: > { %s4443_s9 = sadd.s32 4294967295, %s4373_s30   ;;  %s3432_s10 = sadd.s32 4294967294, %s4373_s30   ;;  %s4373_s30 = sphi %s4428_s30, %s4985_s30   ;;  %s4369_s29 = sphi %s4426_s29, %s4984_s29   ;;  %s4365_s28 = sphi %s4424_s28, %s4983_s28   ;;  %s4361_s27 = sphi %s4422_s27, %s4982_s27  }
   0x4   : > { %s4447_s11 = sadd.s32 1, %s4373_s30   ;;  %s201_s12 = sadd.s32 1, %s4369_s29 }
   0x5   : > { %s198_s13 = ssub.s32 %s4373_s30, %s4447_s11  ;;  %p211_p0 = scmp.ne.s32.totalorder %s4369_s29, %s4365_s28 }
   0x6   : > { %p199_p1 = scmp.eq.s32.totalorder %s198_s13, 0  ;;  %p212_p2 = scmp.eq.s32.totalorder %s4443_s9, 1 }
   0x7   : > { %p217_p3 = scmp.ne.s32.totalorder %s4365_s28, %s4361_s27  ;;  %p218_p4 = scmp.eq.s32.totalorder %s3432_s10, 1 }
   0x8   : > { %s4458_s14 = scalar_select %p199_p1, %s4369_s29, %s201_s12  }
   0x9   : > { %p4460_p5 = por %p212_p2, %p211_p0  ;;  %p4464_p6 = por %p218_p4, %p217_p3 }
   0xa   : > { %p3435_p7 = scmp.ge.s32.totalorder %s4373_s30, 1  ;;  %p265_p8 = scmp.lt.s32.totalorder %s4373_s30, 3 }
   0xc   : > { %p266_p9 = pnand %p3435_p7, %p265_p8 }
   0xd   : > { %v3453_v0 = vld [vmem:[%s4972_s1 + $0x4] sm:$0xf] (!%p266_p9)  ;;  %vm363_vm0 = vcmask (!%p266_p9), 1043456   ;;  %p299_p10 = scmp.lt.s32.totalorder (!%p266_p9), %s4443_s9, 1  ;;  %v319_v1 = vld [vmem:[%s4972_s1] sm:$0xf] (!%p266_p9) }
   0xe   : > { %269 = sbr.rel (%p266_p9) target bundleno = 869 (0x365), region = 52  ;;  %3874 = vmatprep.subr.msk.mxu0 (!%p266_p9), %vm363_vm0, %v3453_v0  ;;  %4140 = vmatprep.subr.msk.mxu1 (!%p266_p9), %vm363_vm0, %v3453_v0  ;;  %vm338_vm1 = vcmask (!%p266_p9), 31744   ;;  %v3480_v5 = vld [vmem:[%s4972_s1 + $0x8] sm:$0xf] (!%p266_p9)  ;;  %v3498_v10 = vld [vmem:[%s4972_s1 + $0xc] sm:$0xf] (!%p266_p9) }
   0xf   : > { %3875 = vmatpush3.msk.msra.mxu0 (!%p266_p9), %vm363_vm0, %v3453_v0  ;;  %4141 = vmatpush3.msk.msra.mxu1 (!%p266_p9), %vm363_vm0, %v3453_v0  ;;  %v3516_v22 = vld [vmem:[%s4972_s1 + $0x10] sm:$0xf] (!%p266_p9)  ;;  %v3534_v32 = vld [vmem:[%s4972_s1 + $0x14] sm:$0xf] (!%p266_p9)  ;;  %v3552_v41 = vld [vmem:[%s4972_s1 + $0x18] sm:$0xf] (!%p266_p9) }
  0x10   : > { %3888 = vmatprep.subr.msk.mxu0 (!%p266_p9), %vm363_vm0, %v319_v1  ;;  %v3570_v50 = vld [vmem:[%s4972_s1 + $0x1c] sm:$0xf] (!%p266_p9)  ;;  %v3588_v59 = vld [vmem:[%s4972_s1 + $0x20] sm:$0xf] (!%p266_p9)  ;;  %vm1748_vm2 = vcmask (!%p266_p9), 64512   ;;  %vm1750_vm3 = vcmask (!%p266_p9), 58368  }
  0x11   : > { %vm1755_vm4 = vcmask (!%p266_p9), 57344   ;;  %s296_s17 = sand.u32 (!%p266_p9), 1, %s4365_s28   ;;  %s3700_s19 = sshll.u32 (!%p266_p9), %s4443_s9, 7  ;;  %vm3311_vm5 = vcmask (!%p266_p9), 523264  }
  0x12   : > { %s3436_s18 = sshll.u32 (!%p266_p9), %s296_s17, 3  ;;  %s4929_s24 = scalar_lea.hbm (!%p266_p9), %s4979_s8, %s3700_s19 }
  0x13   : > { %s298_s20 = scalar_lea.vmem (!%p266_p9), [#allocation3], %s3436_s18  ;;  %s3314_s26 = scalar_lea.sflag (!%p266_p9), [#allocation4], %s296_s17 }
  0x15   : > { %s300_s21 = scalar_select %p299_p10, %s4443_s9, 1 }
  0x16   : > { %s4376_s9 = smov [#allocation3]  }
  0x17   : > { %s4270_s22 = smul.u32 432, %s300_s21  ;;  %s3327_s21 = sshll.u32 %s298_s20, 4  ;;  %s4931_s21 = int_to_ptr.vmem [resolvable:$true] %s3327_s21 }
  0x18   : > { %s4311_s10 = scalar_lea.vmem %s4931_s21, 128  ;;  %s4315_s12 = sshll.u32 %s4376_s9, 4  ;;  %s4316_s12 = int_to_ptr.vmem [resolvable:$false] %s4315_s12 }
  0x19   : > { %s4486_s25 = scalar_lea.vmem %s4971_s0, %s4270_s22  ;;  %p4312_p11 = scmp.ne.s32.totalorder %s4931_s21, %s4311_s10 }
  0x1a   : > { %v3445_v2 = vld [vmem:[%s4486_s25 + $0x1] ss:$2 sm:$0xff]  ;;  %v3446_v3 = vld [vmem:[%s4486_s25 + $0x31] ss:$2 sm:$0xff]  ;;  %v304_v7 = vld [vmem:[%s4486_s25] ss:$2 sm:$0xff]  ;;  %p4318_p0 = scmp.lt.s32.totalorder %s4931_s21, %s4316_s12 }
  0x1b   : > { %v3447_v4 = vld [vmem:[%s4486_s25 + $0x61] ss:$2 sm:$0xff]  ;;  %3876 = vmatprep.mubr.msk.f32.mxu0 %vm338_vm1, %v3445_v2  ;;  %v3448_v6 = vld [vmem:[%s4486_s25 + $0x91] ss:$2 sm:$0xff]  ;;  %v3438_v8 = vld [vmem:[%s4486_s25 + $0x30] ss:$2 sm:$0xff]  ;;  %p4313_p12 = pnand %p4312_p11, %p4460_p5 }
  0x1c   : > { %3877 = vmatmul.mubr.msk.f32.vlgmr.msra.gmra.mrb[0].mxu0 %vm338_vm1, %v3446_v3  ;;  %v3439_v9 = vld [vmem:[%s4486_s25 + $0x60] ss:$2 sm:$0xff]  ;;  %v3440_v11 = vld [vmem:[%s4486_s25 + $0x90] ss:$2 sm:$0xff]  ;;  %v3449_v17 = vld [vmem:[%s4486_s25 + $0xc1] ss:$2 sm:$0xff] }
  0x1d   : > { %3889 = vmatpush3.msk.msra.mxu0 %vm363_vm0, %v319_v1  ;;  %3879 = vmatprep.mubr.msk.f32.mxu0 %vm338_vm1, %v3447_v4  ;;  %v3441_v12 = vld [vmem:[%s4486_s25 + $0xc0] ss:$2 sm:$0xff]  ;;  %v3442_v13 = vld [vmem:[%s4486_s25 + $0xf0] ss:$2 sm:$0xff]  ;;  %v3450_v18 = vld [vmem:[%s4486_s25 + $0xf1] ss:$2 sm:$0xff]  ;;  %p4314_p13 = pneg %p4313_p12 }
  0x1e   : > { %3902 = vmatprep.subr.msk.mxu0 %vm363_vm0, %v3480_v5  ;;  %v3443_v14 = vld [vmem:[%s4486_s25 + $0x120] ss:$2 sm:$0xff]  ;;  %v3444_v15 = vld [vmem:[%s4486_s25 + $0x150] ss:$2 sm:$0xff]  ;;  %3882 = vmatprep.mubr.msk.f32.mxu1 %vm338_vm1, %v3449_v17  ;;  %v3451_v19 = vld [vmem:[%s4486_s25 + $0x121] ss:$2 sm:$0xff] }
  0x1f   : > { %v3472_v16 = vld [vmem:[%s4486_s25 + $0x2] ss:$2 sm:$0xff]  ;;  %v3473_v20 = vld [vmem:[%s4486_s25 + $0x32] ss:$2 sm:$0xff]  ;;  %3883 = vmatmul.mubr.msk.f32.vlgmr.msra.gmra.mrb[0].mxu1 %vm338_vm1, %v3450_v18  ;;  %v3452_v23 = vld [vmem:[%s4486_s25 + $0x151] ss:$2 sm:$0xff] }
  0x20   : > { %3880 = vmatmul.mubr.msk.f32.gmra.mrb[2].mxu0 %vm338_vm1, %v3448_v6  ;;  %v3474_v21 = vld [vmem:[%s4486_s25 + $0x62] ss:$2 sm:$0xff]  ;;  %3885 = vmatprep.mubr.msk.f32.mxu1 %vm338_vm1, %v3451_v19  ;;  %v3475_v24 = vld [vmem:[%s4486_s25 + $0x92] ss:$2 sm:$0xff]  ;;  %v3508_v38 = vld [vmem:[%s4486_s25 + $0x19] ss:$2 sm:$0xff] }
  0x21   : > { %3890 = vmatprep.mubr.msk.f32.mxu0 %vm338_vm1, %v304_v7  ;;  %v3476_v25 = vld [vmem:[%s4486_s25 + $0xc2] ss:$2 sm:$0xff]  ;;  %v3477_v26 = vld [vmem:[%s4486_s25 + $0xf2] ss:$2 sm:$0xff]  ;;  %v3509_v39 = vld [vmem:[%s4486_s25 + $0x49] ss:$2 sm:$0xff] }
  0x22   : > { %v3478_v27 = vld [vmem:[%s4486_s25 + $0x122] ss:$2 sm:$0xff]  ;;  %v3479_v28 = vld [vmem:[%s4486_s25 + $0x152] ss:$2 sm:$0xff]  ;;  %v3510_v40 = vld [vmem:[%s4486_s25 + $0x79] ss:$2 sm:$0xff] }
  0x23   : > { %3886 = vmatmul.mubr.msk.f32.gmra.mrb[2].mxu1 %vm338_vm1, %v3452_v23  ;;  %v3490_v29 = vld [vmem:[%s4486_s25 + $0x18] ss:$2 sm:$0xff]  ;;  %v3491_v30 = vld [vmem:[%s4486_s25 + $0x48] ss:$2 sm:$0xff]  ;;  %v3511_v42 = vld [vmem:[%s4486_s25 + $0xa9] ss:$2 sm:$0xff] }
  0x24   : > { %3891 = vmatmul.mubr.msk.f32.vlgmr.msra.gmra.mrb[0].mxu0 %vm338_vm1, %v3438_v8  ;;  %v3492_v31 = vld [vmem:[%s4486_s25 + $0x78] ss:$2 sm:$0xff]  ;;  %v3493_v33 = vld [vmem:[%s4486_s25 + $0xa8] ss:$2 sm:$0xff]  ;;  %v3512_v43 = vld [vmem:[%s4486_s25 + $0xd9] ss:$2 sm:$0xff] }
  0x25   : > { %3903 = vmatpush3.msk.msra.mxu0 %vm363_vm0, %v3480_v5  ;;  %3893 = vmatprep.mubr.msk.f32.mxu0 %vm338_vm1, %v3439_v9  ;;  %v3494_v34 = vld [vmem:[%s4486_s25 + $0xd8] ss:$2 sm:$0xff]  ;;  %v3495_v35 = vld [vmem:[%s4486_s25 + $0x108] ss:$2 sm:$0xff]  ;;  %v3513_v44 = vld [vmem:[%s4486_s25 + $0x109] ss:$2 sm:$0xff] }
  0x26   : > { %3916 = vmatprep.subr.msk.mxu0 %vm363_vm0, %v3498_v10  ;;  %v3496_v36 = vld [vmem:[%s4486_s25 + $0x138] ss:$2 sm:$0xff]  ;;  %v3497_v37 = vld [vmem:[%s4486_s25 + $0x168] ss:$2 sm:$0xff]  ;;  %v3514_v45 = vld [vmem:[%s4486_s25 + $0x139] ss:$2 sm:$0xff] }
  0x27   : > { %v3515_v46 = vld [vmem:[%s4486_s25 + $0x169] ss:$2 sm:$0xff]  ;;  %v3526_v47 = vld [vmem:[%s4486_s25 + $0x1a] ss:$2 sm:$0xff]  ;;  %v3527_v48 = vld [vmem:[%s4486_s25 + $0x4a] ss:$2 sm:$0xff] }
  0x28   : > { %3894 = vmatmul.mubr.msk.f32.gmra.mrb[2].mxu0 %vm338_vm1, %v3440_v11  ;;  %v3528_v49 = vld [vmem:[%s4486_s25 + $0x7a] ss:$2 sm:$0xff]  ;;  %v3529_v51 = vld [vmem:[%s4486_s25 + $0xaa] ss:$2 sm:$0xff]  ;;  %v3562_v1 = vld [vmem:[%s4486_s25 + $0x31] ss:$2 sm:$0xff] }
  0x29   : > { %3896 = vmatprep.mubr.msk.f32.mxu0 %vm338_vm1, %v3441_v12  ;;  %v3530_v52 = vld [vmem:[%s4486_s25 + $0xda] ss:$2 sm:$0xff]  ;;  %v3531_v53 = vld [vmem:[%s4486_s25 + $0x10a] ss:$2 sm:$0xff]  ;;  %v3563_v2 = vld [vmem:[%s4486_s25 + $0x61] ss:$2 sm:$0xff] }
  0x2a   : > { %v3532_v54 = vld [vmem:[%s4486_s25 + $0x13a] ss:$2 sm:$0xff]  ;;  %v3533_v55 = vld [vmem:[%s4486_s25 + $0x16a] ss:$2 sm:$0xff]  ;;  %v3564_v3 = vld [vmem:[%s4486_s25 + $0x91] ss:$2 sm:$0xff] }
  0x2b   : > { %v3544_v56 = vld [vmem:[%s4486_s25 + $0x30] ss:$2 sm:$0xff]  ;;  %v3545_v57 = vld [vmem:[%s4486_s25 + $0x60] ss:$2 sm:$0xff]  ;;  %v3565_v4 = vld [vmem:[%s4486_s25 + $0xc1] ss:$2 sm:$0xff] }
  0x2c   : > { %3897 = vmatmul.mubr.msk.f32.gmra.mrb[4].mxu0 %vm338_vm1, %v3442_v13  ;;  %v3546_v58 = vld [vmem:[%s4486_s25 + $0x90] ss:$2 sm:$0xff]  ;;  %v3547_v60 = vld [vmem:[%s4486_s25 + $0xc0] ss:$2 sm:$0xff]  ;;  %v3566_v5 = vld [vmem:[%s4486_s25 + $0xf1] ss:$2 sm:$0xff] }
  0x2d   : > { %3899 = vmatprep.mubr.msk.f32.mxu0 %vm338_vm1, %v3443_v14  ;;  %v3548_v61 = vld [vmem:[%s4486_s25 + $0xf0] ss:$2 sm:$0xff]  ;;  %v3549_v62 = vld [vmem:[%s4486_s25 + $0x120] ss:$2 sm:$0xff]  ;;  %v3567_v6 = vld [vmem:[%s4486_s25 + $0x121] ss:$2 sm:$0xff] }
  0x2e   : > { %v3550_v63 = vld [vmem:[%s4486_s25 + $0x150] ss:$2 sm:$0xff]  ;;  %v3551_v0 = vld [vmem:[%s4486_s25 + $0x180] ss:$2 sm:$0xff]  ;;  %v3568_v7 = vld [vmem:[%s4486_s25 + $0x151] ss:$2 sm:$0xff] }
  0x2f   : > { %v3569_v8 = vld [vmem:[%s4486_s25 + $0x181] ss:$2 sm:$0xff]  ;;  %v3580_v9 = vld [vmem:[%s4486_s25 + $0x32] ss:$2 sm:$0xff]  ;;  %v3583_v12 = vld [vmem:[%s4486_s25 + $0xc2] ss:$2 sm:$0xff] }
  0x30   : > { %3900 = vmatmul.mubr.msk.f32.gmra.mrb[6].mxu0 %vm338_vm1, %v3444_v15  ;;  %v3582_v11 = vld [vmem:[%s4486_s25 + $0x92] ss:$2 sm:$0xff]  ;;  %v3585_v14 = vld [vmem:[%s4486_s25 + $0x122] ss:$2 sm:$0xff]  ;;  %v4375_v17 = vmov 0.0   ;;  %s4317_s13 = scalar_lea.vmem %s4316_s12, 256 }
  0x31   : > { %3904 = vmatprep.mubr.msk.f32.mxu0 %vm338_vm1, %v3472_v16  ;;  %v3584_v13 = vld [vmem:[%s4486_s25 + $0xf2] ss:$2 sm:$0xff]  ;;  %v3587_v16 = vld [vmem:[%s4486_s25 + $0x182] ss:$2 sm:$0xff]  ;;  %1749 = vst.msk [vmem:[#allocation2] sm:$0xff] %vm1748_vm2, %v4375_v17  ;;  %1753 = vst.msk [vmem:[#allocation2 + $0x90] sm:$0xff] %vm1748_vm2, %v4375_v17  ;;  %p4319_p1 = scmp.lt.s32.totalorder %s4317_s13, %s4311_s10 }
  0x32   : > { %v3586_v15 = vld [vmem:[%s4486_s25 + $0x152] ss:$2 sm:$0xff]  ;;  %1751 = vst.msk [vmem:[#allocation2 + $0x8] sm:$0x3] %vm1750_vm3, %v4375_v17  ;;  %1754 = vst.msk [vmem:[#allocation2 + $0x98] sm:$0x3] %vm1750_vm3, %v4375_v17 }
  0x33   : > { %1757 = vst.msk [vmem:[#allocation2 + $0x10] sm:$0x1] %vm1755_vm4, %v4375_v17  ;;  %1758 = vst.msk [vmem:[#allocation2 + $0x20] sm:$0x1] %vm1755_vm4, %v4375_v17  ;;  %v3600_v18 = vld [vmem:[%s4973_s2 + $0x8] sm:$0xff]  ;;  %p4320_p2 = por %p4319_p1, %p4318_p0 }
  0x34   : > { %3905 = vmatmul.mubr.msk.f32.vlgmr.msra.gmra.mrb[0].mxu0 %vm338_vm1, %v3473_v20  ;;  %1759 = vst.msk [vmem:[#allocation2 + $0x30] sm:$0x1] %vm1755_vm4, %v4375_v17  ;;  %1760 = vst.msk [vmem:[#allocation2 + $0x40] sm:$0x1] %vm1755_vm4, %v4375_v17  ;;  %4000 = vmatprep.subr.mxu1 %v3600_v18  ;;  %v1793_v20 = vld [vmem:[%s4973_s2] sm:$0xff] }
  0x35   : > { %3917 = vmatpush3.msk.msra.mxu0 %vm363_vm0, %v3498_v10  ;;  %3907 = vmatprep.mubr.msk.f32.mxu0 %vm338_vm1, %v3474_v21  ;;  %v3581_v10 = vld [vmem:[%s4486_s25 + $0x62] ss:$2 sm:$0xff]  ;;  %1761 = vst.msk [vmem:[#allocation2 + $0x50] sm:$0x1] %vm1755_vm4, %v4375_v17  ;;  %1762 = vst.msk [vmem:[#allocation2 + $0x60] sm:$0x1] %vm1755_vm4, %v4375_v17  ;;  %p4321_p3 = pnand %p4320_p2, %p4314_p13 }
  0x36   : > { %3930 = vmatprep.subr.msk.mxu0 %vm363_vm0, %v3516_v22  ;;  %1763 = vst.msk [vmem:[#allocation2 + $0x70] sm:$0x1] %vm1755_vm4, %v4375_v17  ;;  %1764 = vst.msk [vmem:[#allocation2 + $0x80] sm:$0x1] %vm1755_vm4, %v4375_v17  ;;  %4001 = vmatpush3.msra.mxu1 %v3600_v18  ;;  %v3689_v18 = vld [vmem:[%s4486_s25 + $0x169] ss:$2 sm:$0xff] }
  0x37   : > { %1767 = vst.msk [vmem:[#allocation2 + $0x19] sm:$0x1] %vm1755_vm4, %v4375_v17  ;;  %1768 = vst.msk [vmem:[#allocation2 + $0x29] sm:$0x1] %vm1755_vm4, %v4375_v17  ;;  %4014 = vmatprep.subr.mxu1 %v1793_v20 }
  0x38   : > { %3908 = vmatmul.mubr.msk.f32.gmra.mrb[2].mxu0 %vm338_vm1, %v3475_v24  ;;  %1769 = vst.msk [vmem:[#allocation2 + $0x39] sm:$0x1] %vm1755_vm4, %v4375_v17  ;;  %1770 = vst.msk [vmem:[#allocation2 + $0x49] sm:$0x1] %vm1755_vm4, %v4375_v17 }
  0x39   : > { %3910 = vmatprep.mubr.msk.f32.mxu0 %vm338_vm1, %v3476_v25  ;;  %1771 = vst.msk [vmem:[#allocation2 + $0x59] sm:$0x1] %vm1755_vm4, %v4375_v17  ;;  %1772 = vst.msk [vmem:[#allocation2 + $0x69] sm:$0x1] %vm1755_vm4, %v4375_v17  ;;  %v1794_v19 = vld [vmem:[#allocation2 + $0x1] sm:$0xff] }
  0x3a   : > { %1773 = vst.msk [vmem:[#allocation2 + $0x79] sm:$0x1] %vm1755_vm4, %v4375_v17  ;;  %1774 = vst.msk [vmem:[#allocation2 + $0x89] sm:$0x1] %vm1755_vm4, %v4375_v17  ;;  %4002 = vmatprep.mubr.msk.f32.mxu1 %vm1748_vm2, %v1794_v19  ;;  %v3598_v25 = vld [vmem:[%s4974_s3] ss:$0 sm:$0xff] }
  0x3b   : > { %1756 = vst.msk [vmem:[#allocation2] sm:$0x1] %vm1755_vm4, %v4375_v17  ;;  %1765 = vst.msk [vmem:[#allocation2 + $0x90] sm:$0x1] %vm1755_vm4, %v4375_v17 }
  0x3c   : > { %3911 = vmatmul.mubr.msk.f32.gmra.mrb[4].mxu0 %vm338_vm1, %v3477_v26  ;;  %1766 = vst.msk [vmem:[#allocation2 + $0x9] sm:$0x1] %vm1755_vm4, %v4375_v17  ;;  %1775 = vst.msk [vmem:[#allocation2 + $0x99] sm:$0x1] %vm1755_vm4, %v4375_v17  ;;  %v3626_v17 = vld [vmem:[%s4973_s2 + $0x18] sm:$0xff] }
  0x3d   : > { %3913 = vmatprep.mubr.msk.f32.mxu0 %vm338_vm1, %v3478_v27  ;;  %v3599_v27 = vld [vmem:[%s4975_s4] ss:$0 sm:$0xff] }
  0x40   : > { %3914 = vmatmul.mubr.msk.f32.gmra.mrb[6].mxu0 %vm338_vm1, %v3479_v28 }
  0x41   : > { %3918 = vmatprep.mubr.msk.f32.mxu0 %vm338_vm1, %v3490_v29 }
  0x44   : > { %3919 = vmatmul.mubr.msk.f32.vlgmr.msra.gmra.mrb[0].mxu0 %vm338_vm1, %v3491_v30 }
  0x45   : > { %3931 = vmatpush3.msk.msra.mxu0 %vm363_vm0, %v3516_v22  ;;  %3921 = vmatprep.mubr.msk.f32.mxu0 %vm338_vm1, %v3492_v31 }
  0x46   : > { %3944 = vmatprep.subr.msk.mxu0 %vm363_vm0, %v3534_v32 }
  0x48   : > { %3922 = vmatmul.mubr.msk.f32.gmra.mrb[2].mxu0 %vm338_vm1, %v3493_v33 }
  0x49   : > { %3924 = vmatprep.mubr.msk.f32.mxu0 %vm338_vm1, %v3494_v34 }
  0x4c   : > { %3925 = vmatmul.mubr.msk.f32.gmra.mrb[4].mxu0 %vm338_vm1, %v3495_v35 }
  0x4d   : > { %3927 = vmatprep.mubr.msk.f32.mxu0 %vm338_vm1, %v3496_v36 }
  0x50   : > { %3928 = vmatmul.mubr.msk.f32.gmra.mrb[6].mxu0 %vm338_vm1, %v3497_v37 }
  0x51   : > { %3932 = vmatprep.mubr.msk.f32.mxu0 %vm338_vm1, %v3508_v38 }
  0x54   : > { %3933 = vmatmul.mubr.msk.f32.vlgmr.msra.gmra.mrb[0].mxu0 %vm338_vm1, %v3509_v39 }
  0x55   : > { %3945 = vmatpush3.msk.msra.mxu0 %vm363_vm0, %v3534_v32  ;;  %3935 = vmatprep.mubr.msk.f32.mxu0 %vm338_vm1, %v3510_v40  ;;  %v3130_v32 = vld [vmem:[%s4978_s7] sm:$0xf] }
  0x56   : > { %3958 = vmatprep.subr.msk.mxu0 %vm363_vm0, %v3552_v41 }
  0x58   : > { %3936 = vmatmul.mubr.msk.f32.gmra.mrb[2].mxu0 %vm338_vm1, %v3511_v42 }
  0x59   : > { %3938 = vmatprep.mubr.msk.f32.mxu0 %vm338_vm1, %v3512_v43 }
  0x5c   : > { %3939 = vmatmul.mubr.msk.f32.gmra.mrb[4].mxu0 %vm338_vm1, %v3513_v44 }
  0x5d   : > { %3941 = vmatprep.mubr.msk.f32.mxu0 %vm338_vm1, %v3514_v45 }
  0x60   : > { %3942 = vmatmul.mubr.msk.f32.gmra.mrb[6].mxu0 %vm338_vm1, %v3515_v46 }
  0x61   : > { %3946 = vmatprep.mubr.msk.f32.mxu0 %vm338_vm1, %v3526_v47 }
  0x64   : > { %3947 = vmatmul.mubr.msk.f32.vlgmr.msra.gmra.mrb[0].mxu0 %vm338_vm1, %v3527_v48 }
  0x65   : > { %3959 = vmatpush3.msk.msra.mxu0 %vm363_vm0, %v3552_v41  ;;  %3949 = vmatprep.mubr.msk.f32.mxu0 %vm338_vm1, %v3528_v49 }
  0x66   : > { %3972 = vmatprep.subr.msk.mxu0 %vm363_vm0, %v3570_v50 }
  0x68   : > { %3950 = vmatmul.mubr.msk.f32.gmra.mrb[2].mxu0 %vm338_vm1, %v3529_v51 }
  0x69   : > { %3952 = vmatprep.mubr.msk.f32.mxu0 %vm338_vm1, %v3530_v52 }
  0x6c   : > { %3953 = vmatmul.mubr.msk.f32.gmra.mrb[4].mxu0 %vm338_vm1, %v3531_v53 }
  0x6d   : > { %3955 = vmatprep.mubr.msk.f32.mxu0 %vm338_vm1, %v3532_v54 }
  0x70   : > { %3956 = vmatmul.mubr.msk.f32.gmra.mrb[6].mxu0 %vm338_vm1, %v3533_v55 }
  0x71   : > { %3960 = vmatprep.mubr.msk.f32.mxu0 %vm338_vm1, %v3544_v56 }
  0x74   : > { %3961 = vmatmul.mubr.msk.f32.vlgmr.msra.gmra.mrb[0].mxu0 %vm338_vm1, %v3545_v57 }
  0x75   : > { %3973 = vmatpush3.msk.msra.mxu0 %vm363_vm0, %v3570_v50  ;;  %3963 = vmatprep.mubr.msk.f32.mxu0 %vm338_vm1, %v3546_v58 }
  0x76   : > { %3986 = vmatprep.subr.msk.mxu0 %vm363_vm0, %v3588_v59 }
  0x78   : > { %3964 = vmatmul.mubr.msk.f32.gmra.mrb[2].mxu0 %vm338_vm1, %v3547_v60 }
  0x79   : > { %3966 = vmatprep.mubr.msk.f32.mxu0 %vm338_vm1, %v3548_v61 }
  0x7c   : > { %3967 = vmatmul.mubr.msk.f32.gmra.mrb[4].mxu0 %vm338_vm1, %v3549_v62 }
  0x7d   : > { %3969 = vmatprep.mubr.msk.f32.mxu0 %vm338_vm1, %v3550_v63 }
  0x80   : > { %3970 = vmatmul.mubr.msk.f32.gmra.mrb[6].mxu0 %vm338_vm1, %v3551_v0 }
  0x81   : > { %3974 = vmatprep.mubr.msk.f32.mxu0 %vm338_vm1, %v3562_v1 }
  0x84   : > { %3975 = vmatmul.mubr.msk.f32.vlgmr.msra.gmra.mrb[0].mxu0 %vm338_vm1, %v3563_v2 }
  0x85   : > { %3987 = vmatpush3.msk.msra.mxu0 %vm363_vm0, %v3588_v59  ;;  %3977 = vmatprep.mubr.msk.f32.mxu0 %vm338_vm1, %v3564_v3  ;;  %v3617_v59 = vld [vmem:[%s4973_s2 + $0x10] sm:$0xff] }
  0x86   : > { %4126 = vmatprep.subr.msk.mxu0 %vm363_vm0, %v3130_v32 }
  0x88   : > { %3978 = vmatmul.mubr.msk.f32.gmra.mrb[2].mxu0 %vm338_vm1, %v3565_v4 }
  0x89   : > { %3980 = vmatprep.mubr.msk.f32.mxu0 %vm338_vm1, %v3566_v5  ;;  %v3682_v5 = vld [vmem:[%s4486_s25 + $0x19] ss:$2 sm:$0xff] }
  0x8c   : > { %3981 = vmatmul.mubr.msk.f32.gmra.mrb[4].mxu0 %vm338_vm1, %v3567_v6  ;;  %v3683_v6 = vld [vmem:[%s4486_s25 + $0x49] ss:$2 sm:$0xff] }
  0x8d   : > { %3983 = vmatprep.mubr.msk.f32.mxu0 %vm338_vm1, %v3568_v7  ;;  %v3684_v7 = vld [vmem:[%s4486_s25 + $0x79] ss:$2 sm:$0xff] }
  0x90   : > { %3984 = vmatmul.mubr.msk.f32.gmra.mrb[6].mxu0 %vm338_vm1, %v3569_v8 }
  0x91   : > { %3988 = vmatprep.mubr.msk.f32.mxu0 %vm338_vm1, %v3580_v9 }
  0x94   : > { %3989 = vmatmul.mubr.msk.f32.vlgmr.msra.gmra.mrb[0].mxu0 %vm338_vm1, %v3581_v10  ;;  %v3685_v10 = vld [vmem:[%s4486_s25 + $0xa9] ss:$2 sm:$0xff] }
  0x95   : > { %3991 = vmatprep.mubr.msk.f32.mxu0 %vm338_vm1, %v3582_v11  ;;  %4127 = vmatpush3.msk.msra.mxu0 %vm363_vm0, %v3130_v32  ;;  %v3686_v11 = vld [vmem:[%s4486_s25 + $0xd9] ss:$2 sm:$0xff] }
  0x98   : > { %3992 = vmatmul.mubr.msk.f32.gmra.mrb[2].mxu0 %vm338_vm1, %v3583_v12  ;;  %v1785_v12 = vld [vmem:[#allocation2] sm:$0xff] }
  0x99   : > { %3994 = vmatprep.mubr.msk.f32.mxu0 %vm338_vm1, %v3584_v13 }
  0x9c   : > { %3995 = vmatmul.mubr.msk.f32.gmra.mrb[4].mxu0 %vm338_vm1, %v3585_v14  ;;  %v3687_v14 = vld [vmem:[%s4486_s25 + $0x109] ss:$2 sm:$0xff] }
  0x9d   : > { %3997 = vmatprep.mubr.msk.f32.mxu0 %vm338_vm1, %v3586_v15  ;;  %v3688_v15 = vld [vmem:[%s4486_s25 + $0x139] ss:$2 sm:$0xff] }
  0xa0   : > { %3998 = vmatmul.mubr.msk.f32.gmra.mrb[6].mxu0 %vm338_vm1, %v3587_v16 }
  0xa1   : > { %4128 = vmatprep.mubr.msk.f32.mxu0 %vm338_vm1, %v3682_v5 }
  0xa4   : > { %4129 = vmatmul.mubr.msk.f32.vlgmr.msra.gmra.mrb[8].mxu0 %vm338_vm1, %v3683_v6 }
  0xa5   : > { %4131 = vmatprep.mubr.msk.f32.mxu0 %vm338_vm1, %v3684_v7 }
  0xa8   : > { %4132 = vmatmul.mubr.msk.f32.gmra.mrb[10].mxu0 %vm338_vm1, %v3685_v10 }
  0xa9   : > { %4134 = vmatprep.mubr.msk.f32.mxu0 %vm338_vm1, %v3686_v11 }
  0xac   : > { %4135 = vmatmul.mubr.msk.f32.gmra.mrb[12].mxu0 %vm338_vm1, %v3687_v14 }
  0xad   : > { %4137 = vmatprep.mubr.msk.f32.mxu0 %vm338_vm1, %v3688_v15 }
  0xb0   : > { %4138 = vmatmul.mubr.msk.f32.gmra.mrb[14].mxu0 %vm338_vm1, %v3689_v18 }
  0xf2   : > { %v3884_v21 = vpop.f32.mrb[0].mxu1 }
  0xf3   : > { %v453_v22 = vpop.f32.mrb[1].mxu1 }
  0xf6   : > { %v3887_v23 = vpop.f32.mrb[2].mxu1 }
  0xf7   : > { %v463_v24 = vpop.f32.mrb[3].mxu1 }
 0x167   : > { %v3990_v26 = vpop.f32.mrb[0].mxu0 }
 0x168   : > { %v1718_v28 = vmul.f32 %v3990_v26, %v3598_v25  ;;  %v1663_v29 = vpop.f32.mrb[1].mxu0 }
 0x169   : > { %v1717_v30 = vmul.f32 %v3598_v25, %v1663_v29 }
 0x16a   : > { %v1733_v31 = vadd.f32 %v3599_v27, %v1718_v28 }
 0x16b   : > { %v1732_v33 = vadd.f32 %v3599_v27, %v1717_v30  ;;  %v3993_v34 = vpop.f32.mrb[2].mxu0 }
 0x16c   : > { %v1741_v35 = vmax.f32 %v1733_v31, 0.0  ;;  %v1720_v36 = vmul.f32 %v3993_v34, %v3598_v25  ;;  %v1673_v37 = vpop.f32.mrb[3].mxu0  ;;  %v3644_v34 = vld [vmem:[%s4973_s2 + $0x28] sm:$0xff] }
 0x16d   : > { %v1740_v38 = vmax.f32 %v1732_v33, 0.0  ;;  %v1719_v39 = vmul.f32 %v3598_v25, %v1673_v37 }
 0x16e   : > { %1778 = vst.msk [vmem:[#allocation2 + $0x21] sm:$0xff] %vm1748_vm2, %v1741_v35  ;;  %v1735_v40 = vadd.f32 %v3599_v27, %v1720_v36  ;;  %v3653_v36 = vld [vmem:[%s4973_s2 + $0x30] sm:$0xff] }
 0x16f   : > { %1777 = vst.msk [vmem:[#allocation2 + $0x11] sm:$0xff] %vm1748_vm2, %v1740_v38  ;;  %v1734_v41 = vadd.f32 %v3599_v27, %v1719_v39  ;;  %v3996_v42 = vpop.f32.mrb[4].mxu0  ;;  %v3662_v38 = vld [vmem:[%s4973_s2 + $0x38] sm:$0xff] }
 0x170   : > { %v1743_v43 = vmax.f32 %v1735_v40, 0.0  ;;  %v4142_v44 = vadd.f32 %v3996_v42, %v3884_v21  ;;  %v1683_v45 = vpop.f32.mrb[5].mxu0  ;;  %v3671_v40 = vld [vmem:[%s4973_s2 + $0x40] sm:$0xff]  ;;  %v2805_v42 = vld [vmem:[#allocation2 + $0x91] sm:$0xff] }
 0x171   : > { %v1742_v46 = vmax.f32 %v1734_v41, 0.0  ;;  %v4143_v47 = vadd.f32 %v1683_v45, %v453_v22  ;;  %v2658_v41 = vld [vmem:[#allocation2 + $0x90] sm:$0xff] }
 0x172   : > { %1780 = vst.msk [vmem:[#allocation2 + $0x41] sm:$0xff] %vm1748_vm2, %v1743_v43  ;;  %v1722_v48 = vmul.f32 %v4142_v44, %v3598_v25  ;;  %v2952_v43 = vld [vmem:[#allocation2 + $0x92] sm:$0xff] }
 0x173   : > { %1779 = vst.msk [vmem:[#allocation2 + $0x31] sm:$0xff] %vm1748_vm2, %v1742_v46  ;;  %v1721_v49 = vmul.f32 %v4143_v47, %v3598_v25  ;;  %v3999_v50 = vpop.f32.mrb[6].mxu0 }
 0x174   : > { %v1737_v51 = vadd.f32 %v3599_v27, %v1722_v48  ;;  %v4144_v52 = vadd.f32 %v3999_v50, %v3887_v23  ;;  %v1693_v53 = vpop.f32.mrb[7].mxu0 }
 0x175   : > { %v1736_v54 = vadd.f32 %v3599_v27, %v1721_v49  ;;  %v4145_v55 = vadd.f32 %v1693_v53, %v463_v24  ;;  %v4719_v62 = vld [vmem:[#allocation2 + $0x21] sm:$0xff] }
 0x176   : > { %v1745_v56 = vmax.f32 %v1737_v51, 0.0  ;;  %v1724_v57 = vmul.f32 %v4144_v52, %v3598_v25  ;;  %v4712_v58 = vld [vmem:[#allocation2 + $0x11] sm:$0xff]  ;;  %v4767_v19 = vld [vmem:[#allocation2 + $0x20] sm:$0xff] }
 0x177   : > { %v1744_v60 = vmax.f32 %v1736_v54, 0.0  ;;  %v1723_v61 = vmul.f32 %v4145_v55, %v3598_v25  ;;  %4003 = vmatmul.mubr.msk.f32.vlgmr.msra.gmra.mrb[4].mxu1 %vm1748_vm2, %v4712_v58  ;;  %v1786_v16 = vld [vmem:[#allocation2 + $0x10] sm:$0xff]  ;;  %v2062_v24 = vld [vmem:[#allocation2 + $0x2] sm:$0xff]  ;;  %v4130_v44 = vpop.f32.mrb[8].mxu0  ;;  %v3680_v52 = vld [vmem:[%s4976_s5] ss:$0 sm:$0xff] }
 0x178   : > { %1782 = vst.msk [vmem:[#allocation2 + $0x61] sm:$0xff] %vm1748_vm2, %v1745_v56  ;;  %v1739_v63 = vadd.f32 %v3599_v27, %v1724_v57  ;;  %4005 = vmatprep.mubr.msk.f32.mxu1 %vm1748_vm2, %v4719_v62  ;;  %4015 = vmatpush3.msra.mxu1 %v1793_v20  ;;  %v2063_v26 = vld [vmem:[#allocation2 + $0x12] sm:$0xff]  ;;  %v4797_v28 = vld [vmem:[#allocation2 + $0x22] sm:$0xff]  ;;  %v3224_v45 = vpop.f32.mrb[9].mxu0  ;;  %v3681_v54 = vld [vmem:[%s4977_s6] ss:$0 sm:$0xff] }
 0x179   : > { %1781 = vst.msk [vmem:[#allocation2 + $0x51] sm:$0xff] %vm1748_vm2, %v1744_v60  ;;  %v1738_v0 = vadd.f32 %v3599_v27, %v1723_v61  ;;  %4028 = vmatprep.subr.mxu1 %v3617_v59  ;;  %v4729_v4 = vld [vmem:[#allocation2 + $0x41] sm:$0xff] }
 0x17a   : > { %v1747_v1 = vmax.f32 %v1739_v63, 0.0  ;;  %v4725_v2 = vld [vmem:[#allocation2 + $0x31] sm:$0xff]  ;;  %v4776_v21 = vld [vmem:[#allocation2 + $0x40] sm:$0xff] }
 0x17b   : > { %v1746_v3 = vmax.f32 %v1738_v0, 0.0  ;;  %4006 = vmatmul.mubr.msk.f32.gmra.mrb[6].mxu1 %vm1748_vm2, %v4725_v2  ;;  %v4772_v20 = vld [vmem:[#allocation2 + $0x30] sm:$0xff]  ;;  %v3635_v27 = vld [vmem:[%s4973_s2 + $0x20] sm:$0xff]  ;;  %v4133_v46 = vpop.f32.mrb[10].mxu0 }
 0x17c   : > { %1784 = vst.msk [vmem:[#allocation2 + $0x81] sm:$0xff] %vm1748_vm2, %v1747_v1  ;;  %4008 = vmatprep.mubr.msk.f32.mxu1 %vm1748_vm2, %v4729_v4  ;;  %v4801_v29 = vld [vmem:[#allocation2 + $0x32] sm:$0xff]  ;;  %v4805_v30 = vld [vmem:[#allocation2 + $0x42] sm:$0xff]  ;;  %v3234_v47 = vpop.f32.mrb[11].mxu0 }
 0x17d   : > { %1783 = vst.msk [vmem:[#allocation2 + $0x71] sm:$0xff] %vm1748_vm2, %v1746_v3 }
 0x17f   : > { %v4745_v9 = vld [vmem:[#allocation2 + $0x61] sm:$0xff]  ;;  %v4136_v48 = vpop.f32.mrb[12].mxu0 }
 0x180   : > { %v4741_v8 = vld [vmem:[#allocation2 + $0x51] sm:$0xff]  ;;  %v4784_v23 = vld [vmem:[#allocation2 + $0x60] sm:$0xff]  ;;  %v3244_v49 = vpop.f32.mrb[13].mxu0 }
 0x181   : > { %4009 = vmatmul.mubr.msk.f32.gmra.mrb[8].mxu1 %vm1748_vm2, %v4741_v8  ;;  %v4780_v22 = vld [vmem:[#allocation2 + $0x50] sm:$0xff]  ;;  %v4813_v32 = vld [vmem:[#allocation2 + $0x62] sm:$0xff] }
 0x182   : > { %4011 = vmatprep.mubr.msk.f32.mxu1 %vm1748_vm2, %v4745_v9  ;;  %v4809_v31 = vld [vmem:[#allocation2 + $0x52] sm:$0xff] }
 0x183   : > { %v2216_v35 = vld [vmem:[#allocation2 + $0x80] sm:$0xff]  ;;  %v4139_v50 = vpop.f32.mrb[14].mxu0 }
 0x184   : > { %v4753_v13 = vld [vmem:[#allocation2 + $0x71] sm:$0xff]  ;;  %v2363_v37 = vld [vmem:[#allocation2 + $0x81] sm:$0xff]  ;;  %v3254_v51 = vpop.f32.mrb[15].mxu0 }
 0x185   : > { %4012 = vmatmul.mubr.msk.f32.gmra.mrb[10].mxu1 %vm1748_vm2, %v4753_v13  ;;  %v4788_v25 = vld [vmem:[#allocation2 + $0x70] sm:$0xff]  ;;  %v2510_v39 = vld [vmem:[#allocation2 + $0x82] sm:$0xff] }
 0x186   : > { %4016 = vmatprep.mubr.msk.f32.mxu1 %vm1748_vm2, %v1785_v12  ;;  %v4817_v33 = vld [vmem:[#allocation2 + $0x72] sm:$0xff] }
 0x189   : > { %4017 = vmatmul.mubr.msk.f32.vlgmr.msra.gmra.mrb[4].mxu1 %vm1748_vm2, %v1786_v16 }
 0x18a   : > { %4029 = vmatpush3.msra.mxu1 %v3617_v59  ;;  %4019 = vmatprep.mubr.msk.f32.mxu1 %vm1748_vm2, %v4767_v19 }
 0x18b   : > { %4042 = vmatprep.subr.mxu1 %v3626_v17 }
 0x18d   : > { %4020 = vmatmul.mubr.msk.f32.gmra.mrb[6].mxu1 %vm1748_vm2, %v4772_v20 }
 0x18e   : > { %4022 = vmatprep.mubr.msk.f32.mxu1 %vm1748_vm2, %v4776_v21 }
 0x191   : > { %4023 = vmatmul.mubr.msk.f32.gmra.mrb[8].mxu1 %vm1748_vm2, %v4780_v22 }
 0x192   : > { %4025 = vmatprep.mubr.msk.f32.mxu1 %vm1748_vm2, %v4784_v23 }
 0x195   : > { %4026 = vmatmul.mubr.msk.f32.gmra.mrb[10].mxu1 %vm1748_vm2, %v4788_v25 }
 0x196   : > { %4030 = vmatprep.mubr.msk.f32.mxu1 %vm1748_vm2, %v2062_v24 }
 0x199   : > { %4031 = vmatmul.mubr.msk.f32.vlgmr.msra.gmra.mrb[4].mxu1 %vm1748_vm2, %v2063_v26 }
 0x19a   : > { %4043 = vmatpush3.msra.mxu1 %v3626_v17  ;;  %4033 = vmatprep.mubr.msk.f32.mxu1 %vm1748_vm2, %v4797_v28 }
 0x19b   : > { %4056 = vmatprep.subr.mxu1 %v3635_v27 }
 0x19d   : > { %4034 = vmatmul.mubr.msk.f32.gmra.mrb[6].mxu1 %vm1748_vm2, %v4801_v29 }
 0x19e   : > { %4036 = vmatprep.mubr.msk.f32.mxu1 %vm1748_vm2, %v4805_v30 }
 0x1a1   : > { %4037 = vmatmul.mubr.msk.f32.gmra.mrb[8].mxu1 %vm1748_vm2, %v4809_v31 }
 0x1a2   : > { %4039 = vmatprep.mubr.msk.f32.mxu1 %vm1748_vm2, %v4813_v32 }
 0x1a5   : > { %4040 = vmatmul.mubr.msk.f32.gmra.mrb[10].mxu1 %vm1748_vm2, %v4817_v33 }
 0x1a6   : > { %4044 = vmatprep.mubr.msk.f32.mxu1 %vm1748_vm2, %v1786_v16 }
 0x1a9   : > { %4045 = vmatmul.mubr.msk.f32.vlgmr.msra.gmra.mrb[4].mxu1 %vm1748_vm2, %v4767_v19 }
 0x1aa   : > { %4057 = vmatpush3.msra.mxu1 %v3635_v27  ;;  %4047 = vmatprep.mubr.msk.f32.mxu1 %vm1748_vm2, %v4772_v20 }
 0x1ab   : > { %4070 = vmatprep.subr.mxu1 %v3644_v34 }
 0x1ad   : > { %4048 = vmatmul.mubr.msk.f32.gmra.mrb[6].mxu1 %vm1748_vm2, %v4776_v21 }
 0x1ae   : > { %4050 = vmatprep.mubr.msk.f32.mxu1 %vm1748_vm2, %v4780_v22 }
 0x1b1   : > { %4051 = vmatmul.mubr.msk.f32.gmra.mrb[8].mxu1 %vm1748_vm2, %v4784_v23 }
 0x1b2   : > { %4053 = vmatprep.mubr.msk.f32.mxu1 %vm1748_vm2, %v4788_v25 }
 0x1b5   : > { %4054 = vmatmul.mubr.msk.f32.gmra.mrb[10].mxu1 %vm1748_vm2, %v2216_v35 }
 0x1b6   : > { %4058 = vmatprep.mubr.msk.f32.mxu1 %vm1748_vm2, %v4712_v58 }
 0x1b9   : > { %4059 = vmatmul.mubr.msk.f32.vlgmr.msra.gmra.mrb[4].mxu1 %vm1748_vm2, %v4719_v62 }
 0x1ba   : > { %4071 = vmatpush3.msra.mxu1 %v3644_v34  ;;  %4061 = vmatprep.mubr.msk.f32.mxu1 %vm1748_vm2, %v4725_v2 }
 0x1bb   : > { %4084 = vmatprep.subr.mxu1 %v3653_v36 }
 0x1bd   : > { %4062 = vmatmul.mubr.msk.f32.gmra.mrb[6].mxu1 %vm1748_vm2, %v4729_v4 }
 0x1be   : > { %4064 = vmatprep.mubr.msk.f32.mxu1 %vm1748_vm2, %v4741_v8 }
 0x1c1   : > { %4065 = vmatmul.mubr.msk.f32.gmra.mrb[8].mxu1 %vm1748_vm2, %v4745_v9 }
 0x1c2   : > { %4067 = vmatprep.mubr.msk.f32.mxu1 %vm1748_vm2, %v4753_v13 }
 0x1c5   : > { %4068 = vmatmul.mubr.msk.f32.gmra.mrb[10].mxu1 %vm1748_vm2, %v2363_v37 }
 0x1c6   : > { %4072 = vmatprep.mubr.msk.f32.mxu1 %vm1748_vm2, %v2063_v26 }
 0x1c9   : > { %4073 = vmatmul.mubr.msk.f32.vlgmr.msra.gmra.mrb[4].mxu1 %vm1748_vm2, %v4797_v28 }
 0x1ca   : > { %4085 = vmatpush3.msra.mxu1 %v3653_v36  ;;  %4075 = vmatprep.mubr.msk.f32.mxu1 %vm1748_vm2, %v4801_v29 }
 0x1cb   : > { %4098 = vmatprep.subr.mxu1 %v3662_v38 }
 0x1cd   : > { %4076 = vmatmul.mubr.msk.f32.gmra.mrb[6].mxu1 %vm1748_vm2, %v4805_v30 }
 0x1ce   : > { %4078 = vmatprep.mubr.msk.f32.mxu1 %vm1748_vm2, %v4809_v31 }
 0x1d1   : > { %4079 = vmatmul.mubr.msk.f32.gmra.mrb[8].mxu1 %vm1748_vm2, %v4813_v32 }
 0x1d2   : > { %4081 = vmatprep.mubr.msk.f32.mxu1 %vm1748_vm2, %v4817_v33 }
 0x1d5   : > { %4082 = vmatmul.mubr.msk.f32.gmra.mrb[10].mxu1 %vm1748_vm2, %v2510_v39 }
 0x1d6   : > { %4086 = vmatprep.mubr.msk.f32.mxu1 %vm1748_vm2, %v4767_v19 }
 0x1d9   : > { %4087 = vmatmul.mubr.msk.f32.vlgmr.msra.gmra.mrb[4].mxu1 %vm1748_vm2, %v4772_v20 }
 0x1da   : > { %4099 = vmatpush3.msra.mxu1 %v3662_v38  ;;  %4089 = vmatprep.mubr.msk.f32.mxu1 %vm1748_vm2, %v4776_v21 }
 0x1db   : > { %4112 = vmatprep.subr.mxu1 %v3671_v40 }
 0x1dd   : > { %4090 = vmatmul.mubr.msk.f32.gmra.mrb[6].mxu1 %vm1748_vm2, %v4780_v22 }
 0x1de   : > { %4092 = vmatprep.mubr.msk.f32.mxu1 %vm1748_vm2, %v4784_v23 }
 0x1e1   : > { %4093 = vmatmul.mubr.msk.f32.gmra.mrb[8].mxu1 %vm1748_vm2, %v4788_v25 }
 0x1e2   : > { %4095 = vmatprep.mubr.msk.f32.mxu1 %vm1748_vm2, %v2216_v35 }
 0x1e5   : > { %4096 = vmatmul.mubr.msk.f32.gmra.mrb[10].mxu1 %vm1748_vm2, %v2658_v41 }
 0x1e6   : > { %4100 = vmatprep.mubr.msk.f32.mxu1 %vm1748_vm2, %v4719_v62 }
 0x1e9   : > { %4101 = vmatmul.mubr.msk.f32.vlgmr.msra.gmra.mrb[4].mxu1 %vm1748_vm2, %v4725_v2 }
 0x1ea   : > { %4113 = vmatpush3.msra.mxu1 %v3671_v40  ;;  %4103 = vmatprep.mubr.msk.f32.mxu1 %vm1748_vm2, %v4729_v4 }
 0x1ed   : > { %4104 = vmatmul.mubr.msk.f32.gmra.mrb[6].mxu1 %vm1748_vm2, %v4741_v8 }
 0x1ee   : > { %4106 = vmatprep.mubr.msk.f32.mxu1 %vm1748_vm2, %v4745_v9 }
 0x1f1   : > { %4107 = vmatmul.mubr.msk.f32.gmra.mrb[8].mxu1 %vm1748_vm2, %v4753_v13 }
 0x1f2   : > { %4109 = vmatprep.mubr.msk.f32.mxu1 %vm1748_vm2, %v2363_v37 }
 0x1f5   : > { %4110 = vmatmul.mubr.msk.f32.gmra.mrb[10].mxu1 %vm1748_vm2, %v2805_v42 }
 0x1f6   : > { %4114 = vmatprep.mubr.msk.f32.mxu1 %vm1748_vm2, %v4797_v28 }
 0x1f9   : > { %4115 = vmatmul.mubr.msk.f32.vlgmr.msra.gmra.mrb[4].mxu1 %vm1748_vm2, %v4801_v29 }
 0x1fa   : > { %4117 = vmatprep.mubr.msk.f32.mxu1 %vm1748_vm2, %v4805_v30 }
 0x1fd   : > { %4118 = vmatmul.mubr.msk.f32.gmra.mrb[6].mxu1 %vm1748_vm2, %v4809_v31 }
 0x1fe   : > { %4120 = vmatprep.mubr.msk.f32.mxu1 %vm1748_vm2, %v4813_v32 }
 0x201   : > { %4121 = vmatmul.mubr.msk.f32.gmra.mrb[8].mxu1 %vm1748_vm2, %v4817_v33 }
 0x202   : > { %4123 = vmatprep.mubr.msk.f32.mxu1 %vm1748_vm2, %v2510_v39 }
 0x205   : > { %4124 = vmatmul.mubr.msk.f32.gmra.mrb[10].mxu1 %vm1748_vm2, %v2952_v43 }
 0x2cc   : > { %v4116_v53 = vpop.f32.mrb[4].mxu1 }
 0x2cd   : > { %v3100_v55 = vmul.f32 %v4116_v53, %v3680_v52  ;;  %v3045_v56 = vpop.f32.mrb[5].mxu1 }
 0x2ce   : > { %v3099_v57 = vmul.f32 %v3680_v52, %v3045_v56 }
 0x2cf   : > { %v3115_v58 = vadd.f32 %v3681_v54, %v3100_v55 }
 0x2d0   : > { %v4119_v59 = vpop.f32.mrb[6].mxu1  ;;  %v3114_v60 = vadd.f32 %v3681_v54, %v3099_v57 }
 0x2d1   : > { %v3264_v61 = vadd.f32 %v4130_v44, %v3115_v58  ;;  %v3102_v62 = vmul.f32 %v4119_v59, %v3680_v52  ;;  %v3055_v63 = vpop.f32.mrb[7].mxu1 }
 0x2d2   : > { %v3101_v0 = vmul.f32 %v3680_v52, %v3055_v63  ;;  %v3263_v1 = vadd.f32 %v3224_v45, %v3114_v60 }
 0x2d3   : > { %v3117_v2 = vadd.f32 %v3681_v54, %v3102_v62  ;;  %v3272_v12 = vmax.f32 %v3264_v61, 0.0 }
 0x2d4   : > { %v4122_v3 = vpop.f32.mrb[8].mxu1  ;;  %v3116_v4 = vadd.f32 %v3681_v54, %v3101_v0  ;;  %v3271_v5 = vmax.f32 %v3263_v1, 0.0 }
 0x2d5   : > { %v3104_v6 = vmul.f32 %v4122_v3, %v3680_v52  ;;  %v3266_v7 = vadd.f32 %v4133_v46, %v3117_v2  ;;  %v3065_v8 = vpop.f32.mrb[9].mxu1 }
 0x2d6   : > { %v3103_v9 = vmul.f32 %v3680_v52, %v3065_v8  ;;  %v3265_v10 = vadd.f32 %v3234_v47, %v3116_v4  ;;  %3279 = vxpose.xlu0.b32.start [1/8] (short) (narrow) %v3271_v5, 8 }
 0x2d7   : > { %v3119_v11 = vadd.f32 %v3681_v54, %v3104_v6  ;;  %v3274_v25 = vmax.f32 %v3266_v7, 0.0 }
 0x2d8   : > { %v4125_v13 = vpop.f32.mrb[10].mxu1  ;;  %v3118_v14 = vadd.f32 %v3681_v54, %v3103_v9  ;;  %v3273_v21 = vmax.f32 %v3265_v10, 0.0 }
 0x2d9   : > { %v3106_v15 = vmul.f32 %v4125_v13, %v3680_v52  ;;  %v3268_v16 = vadd.f32 %v4136_v48, %v3119_v11  ;;  %v3075_v17 = vpop.f32.mrb[11].mxu1 }
 0x2da   : > { %v3105_v18 = vmul.f32 %v3680_v52, %v3075_v17  ;;  %v3267_v19 = vadd.f32 %v3244_v49, %v3118_v14  ;;  %3280 = vxpose.xlu0.b32.cont [2/8] (short) (narrow) %v3272_v12, 8 }
 0x2db   : > { %v3121_v20 = vadd.f32 %v3681_v54, %v3106_v15  ;;  %v3276_v27 = vmax.f32 %v3268_v16, 0.0 }
 0x2dc   : > { %v3120_v22 = vadd.f32 %v3681_v54, %v3105_v18  ;;  %v3275_v26 = vmax.f32 %v3267_v19, 0.0 }
 0x2dd   : > { %v3270_v23 = vadd.f32 %v4139_v50, %v3121_v20 }
 0x2de   : > { %v3269_v24 = vadd.f32 %v3254_v51, %v3120_v22  ;;  %3281 = vxpose.xlu0.b32.cont [3/8] (short) (narrow) %v3273_v21, 8 }
 0x2df   : > { %v3278_v29 = vmax.f32 %v3270_v23, 0.0 }
 0x2e0   : > { %v3277_v28 = vmax.f32 %v3269_v24, 0.0 }
 0x2e2   : > { %3282 = vxpose.xlu0.b32.cont [4/8] (short) (narrow) %v3274_v25, 8 }
 0x2e6   : > { %3283 = vxpose.xlu0.b32.cont [5/8] (short) (narrow) %v3275_v26, 8 }
 0x2ea   : > { %3284 = vxpose.xlu0.b32.cont [6/8] (short) (narrow) %v3276_v27, 8 }
 0x2ee   : > { %3285 = vxpose.xlu0.b32.cont [7/8] (short) (narrow) %v3277_v28, 8 }
 0x2f2   : > { %3286 = vxpose.xlu0.b32.end [8/8] (short) (narrow) %v3278_v29, 8 }
 0x356   : > { %v3295_v30 = vpop.trf.xlu0 }
 0x357   : > { %3312 = vst.msk [vmem:[%s298_s20] sm:$0xff] %vm3311_vm5, %v3295_v30 }
 0x358   : > { %4324 = shalt.err (!%p4321_p3)
}
 0x359   : > { %s4325_s25 = scalar_lea.hbm %s4929_s24, 128  ;;  %s4329_s19 = scalar_lea.hbm %s4979_s8, 256 }
 0x35a   : > { %p4326_p4 = scmp.ne.s32.totalorder %s4929_s24, %s4325_s25  ;;  %p4330_p9 = scmp.lt.u32.totalorder %s4929_s24, %s4979_s8 }
 0x35b   : > { %p4331_p10 = scmp.lt.u32.totalorder %s4329_s19, %s4325_s25  ;;  %p4333_p12 = scmp.lt.u32.totalorder %s4325_s25, %s4929_s24 }
 0x35c   : > { %p4327_p7 = pnand %p4326_p4, %p4460_p5 }
 0x35d   : > { %p4332_p11 = por %p4331_p10, %p4330_p9 }
 0x35e   : > { %p4328_p8 = pneg %p4327_p7 }
 0x35f   : > { %p4334_p13 = por %p4333_p12, %p4332_p11 }
 0x361   : > { %p4335_p0 = pnand %p4334_p13, %p4328_p8 }
 0x363   : > { %4338 = shalt.err (!%p4335_p0)
}
 0x364   : > { %4271 = dma.vmem_to_hbm [thread:$0]  (%p4460_p5), %s4931_s21, 128, %s4929_s24, %s3314_s26  }
 0x365 PF: > { %p4277_p1 = scmp.ge.s32.totalorder %s4373_s30, 2  ;;  %s3339_s23 = sand.u32 1, %s4361_s27  }
 0x366   : > { %s3340_s10 = scalar_lea.sflag [#allocation4], %s3339_s23 }
 0x367   : > { %p4274_p2 = pnand %p4277_p1, %p4464_p6 }
 0x369   : > { %4356 = dma.done.wait (!%p4274_p2), %s3340_s10, 128  }
 0x36a   : > { %4358 = vsyncadd (!%p4274_p2), %s3340_s10, 4294967168  ;;  %p18_p3 = scmp.ge.s32.totalorder %s4447_s11, 4   ;;  %s4982_s27 = smov %s4365_s28 }
 0x36b   : > { %s4983_s28 = smov %s4369_s29  ;;  %s4984_s29 = smov %s4458_s14 }
 0x36c   : > { %s4985_s30 = smov %s4447_s11  ;;  %20 = sbr.rel (!%p18_p3) target bundleno = 3 (0x3), region = 177 }
 0x373   :  { %3345 = vsyncpa [#allocation4], 1 }
 0x374   :  { %3347 = vsyncpa [#allocation4 + $0x1], 1 }

</bundles_post_ra>
